<compile_context>
chip_gen: v6e
topology: v6e:2x2x1
jax: 0.10.0
libtpu: 0.0.40
codegen_flags: <defaults>
</compile_context>

<pallas_src>
import jax
import jax.numpy as jnp
from jax.experimental import pallas as pl
from jax.experimental.pallas import tpu as pltpu

INPUT_DIM = 1024
HIDDEN_DIM = 500          # logical hidden width (matches the PyTorch module)
HIDDEN_PAD = 512          # lane-/MXU-aligned hidden width used inside the kernel
OUTPUT_DIM = 256
NEG_SLOPE = 0.01          # nn.LeakyReLU() default


def _round_up(n, m):
    return ((n + m - 1) // m) * m


def critic_mnist_kernel(x_ref, w1_ref, b1_ref, w2_ref, b2_ref, o_ref):
    # Fused hot path: cast-in-kernel -> MXU matmul -> bias -> LeakyReLU (f32)
    # -> MXU matmul -> bias -> store. Everything stays in VMEM.
    x = x_ref[...].astype(w1_ref.dtype)               # in-kernel operand cast (no wrapper pass over x)
    h = jnp.dot(x, w1_ref[...], preferred_element_type=jnp.float32)
    h = h + b1_ref[...]                               # bias kept in f32
    h = jnp.where(h > 0, h, NEG_SLOPE * h)            # LeakyReLU(0.01) on the VPU, f32
    h = h.astype(w2_ref.dtype)                        # operand dtype for the 2nd MXU pass
    out = jnp.dot(h, w2_ref[...], preferred_element_type=jnp.float32)
    o_ref[...] = (out + b2_ref[...]).astype(o_ref.dtype)


def prepare_params(w1, b1, w2, b2, compute_dtype=jnp.bfloat16):
    """One-time parameter prep (hoisted out of the forward hot path).

    * Zero-pads the hidden dim 500 -> 512: padded w1 cols / b1 entries / w2
      rows contribute exactly 0 and LeakyReLU(0)=0, so results match the
      500-wide model.
    * Casts matmul weights to `compute_dtype` (bf16 by default); biases stay
      f32. Pass compute_dtype=None for the exact-f32 path.
    """
    pad = HIDDEN_PAD - w1.shape[1]
    if pad > 0:
        w1 = jnp.pad(w1, ((0, 0), (0, pad)))
        b1 = jnp.pad(b1, ((0, 0), (0, pad)))
        w2 = jnp.pad(w2, ((0, pad), (0, 0)))
    b1 = b1.astype(jnp.float32)
    b2 = b2.astype(jnp.float32)
    if compute_dtype is not None:
        w1 = w1.astype(compute_dtype)
        w2 = w2.astype(compute_dtype)
    return w1, b1, w2, b2


def critic_forward(x, w1, b1, w2, b2, *, block_b=512):
    """Forward pass of Critic(mode='mnist').

    Expects parameters prepared once with prepare_params() (padded hidden dim,
    weights optionally pre-cast to bf16). x keeps its dtype; any low-precision
    cast happens inside the kernel.
    """
    # Glue: x.view(-1, input_dim)
    x2d = x.reshape(-1, INPUT_DIM)
    B = x2d.shape[0]

    # Batch tile: always a multiple of 8, capped at block_b. No full-array pad
    # of x — the ragged tail block is handled by Pallas partial-block masking
    # (row-independent matmuls, so garbage OOB rows never touch valid rows and
    # their output writes are discarded).
    tb = _round_up(min(block_b, B), 8)
    if B >= 512 and tb >= B:
        # v7x megacore: keep >= 2 grid steps so both TensorCores get work.
        tb = _round_up((B + 1) // 2, 8)
    grid = pl.cdiv(B, tb)

    x_item = jnp.dtype(x2d.dtype).itemsize
    w_item = jnp.dtype(w1.dtype).itemsize
    cost = pl.CostEstimate(
        flops=2 * B * (INPUT_DIM * HIDDEN_PAD + HIDDEN_PAD * OUTPUT_DIM),
        transcendentals=0,
        bytes_accessed=(
            B * INPUT_DIM * x_item                  # x (streamed)
            + INPUT_DIM * HIDDEN_PAD * w_item       # w1 (resident)
            + HIDDEN_PAD * OUTPUT_DIM * w_item      # w2 (resident)
            + (HIDDEN_PAD + OUTPUT_DIM) * 4         # biases (f32)
            + B * OUTPUT_DIM * 4                    # out (f32)
        ),
    )

    return pl.pallas_call(
        critic_mnist_kernel,
        out_shape=jax.ShapeDtypeStruct((B, OUTPUT_DIM), jnp.float32),
        grid_spec=pltpu.PrefetchScalarGridSpec(
            num_scalar_prefetch=0,
            grid=(grid,),
            in_specs=[
                # streamed per batch tile (double-buffered by the pipeline)
                pl.BlockSpec((tb, INPUT_DIM), lambda i: (i, 0)),
                # constant index_map -> weights/biases stay VMEM-resident
                pl.BlockSpec((INPUT_DIM, HIDDEN_PAD), lambda i: (0, 0)),
                pl.BlockSpec((1, HIDDEN_PAD), lambda i: (0, 0)),
                pl.BlockSpec((HIDDEN_PAD, OUTPUT_DIM), lambda i: (0, 0)),
                pl.BlockSpec((1, OUTPUT_DIM), lambda i: (0, 0)),
            ],
            out_specs=pl.BlockSpec((tb, OUTPUT_DIM), lambda i: (i, 0)),
        ),
        compiler_params=pltpu.CompilerParams(
            dimension_semantics=("parallel",),
            # Large tiles + resident weights overshoot v5e's 16 MiB default
            # scoped VMEM; 48 MiB keeps headroom and stays below v7x's 64 MiB.
            vmem_limit_bytes=48 * 1024 * 1024,
        ),
        cost_estimate=cost,
    )(x2d, w1, b1, w2, b2)


def init_params(key):
    """Deterministic init mirroring the module: xavier_normal_ weights,
    PyTorch-default uniform biases. Stored as (in, out) / (1, out), f32."""
    k1, k2, k3, k4 = jax.random.split(key, 4)

    def xavier_normal(k, fan_in, fan_out):
        std = (2.0 / (fan_in + fan_out)) ** 0.5
        return std * jax.random.normal(k, (fan_in, fan_out), dtype=jnp.float32)

    def bias_uniform(k, fan_in, fan_out):
        bound = 1.0 / (fan_in ** 0.5)
        return jax.random.uniform(
            k, (1, fan_out), minval=-bound, maxval=bound, dtype=jnp.float32
        )

    w1 = xavier_normal(k1, INPUT_DIM, HIDDEN_DIM)
    b1 = bias_uniform(k2, INPUT_DIM, HIDDEN_DIM)
    w2 = xavier_normal(k3, HIDDEN_DIM, OUTPUT_DIM)
    b2 = bias_uniform(k4, HIDDEN_DIM, OUTPUT_DIM)
    return w1, b1, w2, b2


def _reference(x, w1, b1, w2, b2):
    x2d = x.reshape(-1, INPUT_DIM)
    h = x2d @ w1 + b1
    h = jnp.where(h > 0, h, NEG_SLOPE * h)
    return h @ w2 + b2


if __name__ == "__main__":
    key = jax.random.PRNGKey(0)
    kx, kx2, kp = jax.random.split(key, 3)
    w1, b1, w2, b2 = init_params(kp)                    # original-layout f32 params

    # One-time weight prep (pad 500->512; bf16 / f32 operand variants).
    params_bf16 = prepare_params(w1, b1, w2, b2, compute_dtype=jnp.bfloat16)
    params_f32 = prepare_params(w1, b1, w2, b2, compute_dtype=None)

    fwd = jax.jit(critic_forward, static_argnames=("block_b",))

    # --- Test 1: small mnist-like input (B=8, C=1, H=32, W=32) -> (8, 1024), bf16 default ---
    x = jax.random.normal(kx, (8, 1, 32, 32), dtype=jnp.float32)
    out = jax.block_until_ready(fwd(x, *params_bf16))
    ref = _reference(x, w1, b1, w2, b2)
    assert out.shape == (8, OUTPUT_DIM)
    assert jnp.allclose(out, ref, atol=1e-1, rtol=1e-1)

    # --- Test 2: batch not divisible by the tile (ragged tail block, no x pad) ---
    x2 = jax.random.normal(kx2, (200, 1, 32, 32), dtype=jnp.float32)
    out2 = jax.block_until_ready(fwd(x2, *params_bf16, block_b=128))
    ref2 = _reference(x2, w1, b1, w2, b2)
    assert out2.shape == (200, OUTPUT_DIM)
    assert jnp.allclose(out2, ref2, atol=1e-1, rtol=1e-1)

    # --- Test 3: exact f32 operand path (bit-matches the reference numerics) ---
    out3 = jax.block_until_ready(fwd(x2, *params_f32))
    assert out3.shape == (200, OUTPUT_DIM)
    assert jnp.allclose(out3, ref2, atol=1e-4, rtol=1e-4)

    print("KERNEL_OK")
</pallas_src>

<mosaic_0001>
module attributes {stable_mosaic.version = 11 : i64} {
  func.func @critic_mnist_kernel(%arg0: i32, %arg1: memref<8x1024xf32, #tpu.memory_space<vmem>>, %arg2: memref<1024x512xbf16, #tpu.memory_space<vmem>>, %arg3: memref<1x512xf32, #tpu.memory_space<vmem>>, %arg4: memref<512x256xbf16, #tpu.memory_space<vmem>>, %arg5: memref<1x256xf32, #tpu.memory_space<vmem>>, %arg6: memref<8x256xf32, #tpu.memory_space<vmem>>) attributes {dimension_semantics = [#tpu.dimension_semantics<parallel>], iteration_bounds = array<i64: 1>, scalar_prefetch = 0 : i64, scratch_operands = 0 : i64, tpu.core_type = #tpu.core_type<tc>, window_params = [{transform_indices = @transform_0, window_bounds = array<i64: 8, 1024>}, {pipeline_mode = #tpu.pipeline_mode<synchronous>, transform_indices = @transform_1, window_bounds = array<i64: 1024, 512>}, {pipeline_mode = #tpu.pipeline_mode<synchronous>, transform_indices = @transform_2, window_bounds = array<i64: 1, 512>}, {pipeline_mode = #tpu.pipeline_mode<synchronous>, transform_indices = @transform_3, window_bounds = array<i64: 512, 256>}, {pipeline_mode = #tpu.pipeline_mode<synchronous>, transform_indices = @transform_4, window_bounds = array<i64: 1, 256>}, {transform_indices = @transform_5, window_bounds = array<i64: 8, 256>}]} {
    %c0 = arith.constant 0 : index
    %c0_0 = arith.constant 0 : index
    %0 = vector.load %arg1[%c0, %c0_0] : memref<8x1024xf32, #tpu.memory_space<vmem>>, vector<8x1024xf32>
    %1 = arith.truncf %0 : vector<8x1024xf32> to vector<8x1024xbf16>
    %c0_1 = arith.constant 0 : index
    %c0_2 = arith.constant 0 : index
    %2 = vector.load %arg2[%c0_1, %c0_2] : memref<1024x512xbf16, #tpu.memory_space<vmem>>, vector<1024x512xbf16>
    %cst = arith.constant dense<0.000000e+00> : vector<8x512xf32>
    %3 = tpu.matmul %1, %2, %cst {dimension_numbers = #tpu.dot_dimension_numbers<[1], [0], [0], [1], [0, 0, 1, 1], [], []>} : vector<8x1024xbf16>, vector<1024x512xbf16>, vector<8x512xf32> -> vector<8x512xf32>
    %c0_3 = arith.constant 0 : index
    %c0_4 = arith.constant 0 : index
    %4 = vector.load %arg3[%c0_3, %c0_4] : memref<1x512xf32, #tpu.memory_space<vmem>>, vector<1x512xf32>
    %5 = vector.broadcast %4 : vector<1x512xf32> to vector<8x512xf32>
    %6 = arith.addf %3, %5 : vector<8x512xf32>
    %cst_5 = arith.constant 0.000000e+00 : f32
    %7 = vector.broadcast %cst_5 : f32 to vector<8x512xf32>
    %8 = arith.cmpf ogt, %6, %7 : vector<8x512xf32>
    %cst_6 = arith.constant 0.00999999977 : f32
    %9 = vector.broadcast %cst_6 : f32 to vector<8x512xf32>
    %10 = arith.mulf %9, %6 : vector<8x512xf32>
    %11 = arith.select %8, %6, %10 : vector<8x512xi1>, vector<8x512xf32>
    %12 = arith.truncf %11 : vector<8x512xf32> to vector<8x512xbf16>
    %c0_7 = arith.constant 0 : index
    %c0_8 = arith.constant 0 : index
    %13 = vector.load %arg4[%c0_7, %c0_8] : memref<512x256xbf16, #tpu.memory_space<vmem>>, vector<512x256xbf16>
    %cst_9 = arith.constant dense<0.000000e+00> : vector<8x256xf32>
    %14 = tpu.matmul %12, %13, %cst_9 {dimension_numbers = #tpu.dot_dimension_numbers<[1], [0], [0], [1], [0, 0, 1, 1], [], []>} : vector<8x512xbf16>, vector<512x256xbf16>, vector<8x256xf32> -> vector<8x256xf32>
    %c0_10 = arith.constant 0 : index
    %c0_11 = arith.constant 0 : index
    %15 = vector.load %arg5[%c0_10, %c0_11] : memref<1x256xf32, #tpu.memory_space<vmem>>, vector<1x256xf32>
    %16 = vector.broadcast %15 : vector<1x256xf32> to vector<8x256xf32>
    %17 = arith.addf %14, %16 : vector<8x256xf32>
    %c0_12 = arith.constant 0 : index
    %c0_13 = arith.constant 0 : index
    %18 = vector.load %arg6[%c0_12, %c0_13] : memref<8x256xf32, #tpu.memory_space<vmem>>, vector<8x256xf32>
    tpu.vector_store %arg6[%c0_12, %c0_13], %17 {strides = array<i32>} : memref<8x256xf32, #tpu.memory_space<vmem>>, vector<8x256xf32>,
    return
  }
  func.func @transform_0(%arg0: i32) -> (i32, i32) {
    %c0_i32 = arith.constant 0 : i32
    %c0_i32_0 = arith.constant 0 : i32
    return %arg0, %c0_i32 : i32, i32
  }
  func.func @transform_1(%arg0: i32) -> (i32, i32) {
    %c0_i32 = arith.constant 0 : i32
    %c0_i32_0 = arith.constant 0 : i32
    %c0_i32_1 = arith.constant 0 : i32
    return %c0_i32, %c0_i32_0 : i32, i32
  }
  func.func @transform_2(%arg0: i32) -> (i32, i32) {
    %c0_i32 = arith.constant 0 : i32
    %c0_i32_0 = arith.constant 0 : i32
    %c0_i32_1 = arith.constant 0 : i32
    return %c0_i32, %c0_i32_0 : i32, i32
  }
  func.func @transform_3(%arg0: i32) -> (i32, i32) {
    %c0_i32 = arith.constant 0 : i32
    %c0_i32_0 = arith.constant 0 : i32
    %c0_i32_1 = arith.constant 0 : i32
    return %c0_i32, %c0_i32_0 : i32, i32
  }
  func.func @transform_4(%arg0: i32) -> (i32, i32) {
    %c0_i32 = arith.constant 0 : i32
    %c0_i32_0 = arith.constant 0 : i32
    %c0_i32_1 = arith.constant 0 : i32
    return %c0_i32, %c0_i32_0 : i32, i32
  }
  func.func @transform_5(%arg0: i32) -> (i32, i32) {
    %c0_i32 = arith.constant 0 : i32
    %c0_i32_0 = arith.constant 0 : i32
    return %arg0, %c0_i32 : i32, i32
  }
}

</mosaic_0001>

<bundles_post_ra>
// kernel: critic_forward.1
= control target key start
LH: loop header
LB: loop body
LE: loop exit
PB: predicated region body
PF: predicated region fallthrough
CT: control target
= control target key end

     0   :  { %10 = vsyncpa [#allocation3], 0  ;;  %s3476_s0 = inlined_call_operand.vmem [shape: f32[8,1024], index: 0, kind: input, shape index: {}]   ;;  %s3477_s1 = inlined_call_operand.hbm [shape: bf16[1024,512], index: 1, kind: input, shape index: {}]   ;;  %s3478_s2 = inlined_call_operand.vmem [shape: f32[1,512], index: 2, kind: input, shape index: {}]   ;;  %s3479_s3 = inlined_call_operand.hbm [shape: bf16[512,256], index: 3, kind: input, shape index: {}]   ;;  %s3480_s4 = inlined_call_operand.vmem [shape: f32[1,256], index: 4, kind: input, shape index: {}]   ;;  %s3481_s5 = inlined_call_operand.hbm [shape: f32[8,256], index: 5, kind: output, shape index: {}]  }
   0x1   :  { %11 = vsyncpa [#allocation6], 0 }
   0x2   :  { %12 = vsyncpa [#allocation4], 0  ;;  %s3336_s18 = smov [#allocation2]  }
   0x3   :  { %s20_s19 = sshll.u32 %s3336_s18, 4  ;;  %s21_s19 = int_to_ptr.vmem [resolvable:$true] %s20_s19 }
   0x4   :  { %s3278_s20 = scalar_lea.vmem %s21_s19, 32768  ;;  %p3283_p1 = scmp.lt.s32.totalorder %s21_s19, %s21_s19 }
   0x5   :  { %p3279_p0 = scmp.ne.s32.totalorder %s21_s19, %s3278_s20  ;;  %p3284_p2 = scmp.lt.s32.totalorder %s3278_s20, %s3278_s20 }
   0x7   :  { %p3285_p3 = por %p3284_p2, %p3283_p1 }
   0x9   :  { %p3286_p4 = pnand %p3285_p3, %p3279_p0 }
   0xb   :  { %3289 = shalt.err (!%p3286_p4)
}
   0xc   :  { %s3337_s21 = smov 256   ;;  %s3338_s22 = smov 16  }
   0xd   :  { %26 = dma.hbm_to_vmem [thread:$0]  %s3477_s1, 32768, %s21_s19, [#allocation3], %s3337_s21, %s3337_s21, %s3338_s22  }
   0xe   :  { %s3339_s25 = smov [#allocation5]  }
   0xf   :  { %s34_s26 = sshll.u32 %s3339_s25, 4  ;;  %s35_s26 = int_to_ptr.vmem [resolvable:$true] %s34_s26 }
  0x10   :  { %s3298_s27 = scalar_lea.vmem %s35_s26, 8192  ;;  %p3303_p6 = scmp.lt.s32.totalorder %s35_s26, %s35_s26 }
  0x11   :  { %p3299_p5 = scmp.ne.s32.totalorder %s35_s26, %s3298_s27  ;;  %p3304_p7 = scmp.lt.s32.totalorder %s3298_s27, %s3298_s27 }
  0x13   :  { %p3305_p8 = por %p3304_p7, %p3303_p6 }
  0x15   :  { %p3306_p9 = pnand %p3305_p8, %p3299_p5 }
  0x17   :  { %3309 = shalt.err (!%p3306_p9)
}
  0x18   :  { %s3340_s28 = smov 128   ;;  %s3341_s29 = smov 8  }
  0x19   :  { %40 = dma.hbm_to_vmem [thread:$0]  %s3479_s3, 8192, %s35_s26, [#allocation6], %s3340_s28, %s3340_s28, %s3341_s29  }
  0x1a   :  { %3330 = dma.done.wait [#allocation3], 32768  }
  0x1b   :  { %3331 = vsyncadd [#allocation3], 4294934528 }
  0x1c   :  { %3332 = dma.done.wait [#allocation6], 8192  }
  0x1d   :  { %3333 = vsyncadd [#allocation6], 4294959104  ;;  %v2790_v0 = vld [vmem:[#allocation2 + $0xe4] ss:$16 sps:$4 sm:$0xff]   ;;  %v2794_v2 = vld [vmem:[#allocation2 + $0xe0] ss:$16 sps:$4 sm:$0xff]  }
  0x1e   :  { %v2792_v1 = vld [vmem:[#allocation2 + $0x2e4] ss:$16 sps:$4 sm:$0xff]   ;;  %1623 = vmatprep.subr.bf16.mxu0 %v2790_v0  ;;  %v2795_v3 = vld [vmem:[#allocation2 + $0x2e0] ss:$16 sps:$4 sm:$0xff]   ;;  %v50_v46 = vld [vmem:[%s3476_s0 + $0x8] sm:$0xff]  ;;  %s3342_s23 = smov [#allocation7]  }
  0x1f   :  { %1664 = vmatprep.subr.bf16.mxu1 %v2792_v1  ;;  %v2796_v4 = vld [vmem:[#allocation2 + $0xc4] ss:$16 sps:$4 sm:$0xff]   ;;  %1624 = vmatpush1.bf16.msra.mxu0 %v2794_v2  ;;  %v2800_v6 = vld [vmem:[#allocation2 + $0xc0] ss:$16 sps:$4 sm:$0xff]   ;;  %v3382_v49 = vpack.c.bf16 %v50_v46, %v50_v46  ;;  %v52_v50 = vld [vmem:[%s3476_s0 + $0x18] sm:$0xff]  ;;  %s2453_s24 = sshll.u32 %s3342_s23, 4  ;;  %s2454_s24 = int_to_ptr.vmem [resolvable:$true] %s2453_s24 }
  0x20   :  { %1665 = vmatpush1.bf16.msra.mxu1 %v2795_v3  ;;  %v2798_v5 = vld [vmem:[#allocation2 + $0x2c4] ss:$16 sps:$4 sm:$0xff]   ;;  %1625 = vmatprep.subr.bf16.mxu0 %v2796_v4  ;;  %v2801_v7 = vld [vmem:[#allocation2 + $0x2c0] ss:$16 sps:$4 sm:$0xff]   ;;  %v3387_v52 = vpack.c.bf16 %v52_v50, %v52_v50  ;;  %p3315_p11 = scmp.lt.s32.totalorder %s2454_s24, %s2454_s24 }
  0x21   :  { %1666 = vmatprep.subr.bf16.mxu1 %v2798_v5  ;;  %v2802_v8 = vld [vmem:[#allocation2 + $0xa4] ss:$16 sps:$4 sm:$0xff]   ;;  %v2806_v10 = vld [vmem:[#allocation2 + $0xa0] ss:$16 sps:$4 sm:$0xff]   ;;  %1655 = vmatprep.mubr.bf16.mxu0 %v3382_v49 }
  0x22   :  { %v2804_v9 = vld [vmem:[#allocation2 + $0x2a4] ss:$16 sps:$4 sm:$0xff]   ;;  %v2807_v11 = vld [vmem:[#allocation2 + $0x2a0] ss:$16 sps:$4 sm:$0xff]   ;;  %1696 = vmatprep.mubr.bf16.mxu1 %v3387_v52 }
  0x23   :  { %1626 = vmatpush1.bf16.msra.mxu0 %v2800_v6  ;;  %v2808_v12 = vld [vmem:[#allocation2 + $0x84] ss:$16 sps:$4 sm:$0xff]   ;;  %v2812_v14 = vld [vmem:[#allocation2 + $0x80] ss:$16 sps:$4 sm:$0xff]  }
  0x24   :  { %1667 = vmatpush1.bf16.msra.mxu1 %v2801_v7  ;;  %1627 = vmatprep.subr.bf16.mxu0 %v2802_v8  ;;  %v2810_v13 = vld [vmem:[#allocation2 + $0x284] ss:$16 sps:$4 sm:$0xff]   ;;  %v2813_v15 = vld [vmem:[#allocation2 + $0x280] ss:$16 sps:$4 sm:$0xff]  }
  0x25   :  { %1668 = vmatprep.subr.bf16.mxu1 %v2804_v9  ;;  %v2814_v16 = vld [vmem:[#allocation2 + $0x64] ss:$16 sps:$4 sm:$0xff]   ;;  %v2818_v18 = vld [vmem:[#allocation2 + $0x60] ss:$16 sps:$4 sm:$0xff]  }
  0x26   :  { %v2816_v17 = vld [vmem:[#allocation2 + $0x264] ss:$16 sps:$4 sm:$0xff]   ;;  %v2819_v19 = vld [vmem:[#allocation2 + $0x260] ss:$16 sps:$4 sm:$0xff]  }
  0x27   :  { %1628 = vmatpush1.bf16.msra.mxu0 %v2806_v10  ;;  %v2820_v20 = vld [vmem:[#allocation2 + $0x44] ss:$16 sps:$4 sm:$0xff]   ;;  %v2824_v22 = vld [vmem:[#allocation2 + $0x40] ss:$16 sps:$4 sm:$0xff]  }
  0x28   :  { %1669 = vmatpush1.bf16.msra.mxu1 %v2807_v11  ;;  %1629 = vmatprep.subr.bf16.mxu0 %v2808_v12  ;;  %v2822_v21 = vld [vmem:[#allocation2 + $0x244] ss:$16 sps:$4 sm:$0xff]   ;;  %v2825_v23 = vld [vmem:[#allocation2 + $0x240] ss:$16 sps:$4 sm:$0xff]  }
  0x29   :  { %1670 = vmatprep.subr.bf16.mxu1 %v2810_v13  ;;  %v2826_v24 = vld [vmem:[#allocation2 + $0x24] ss:$16 sps:$4 sm:$0xff]   ;;  %v2830_v26 = vld [vmem:[#allocation2 + $0x20] ss:$16 sps:$4 sm:$0xff]  }
  0x2a   :  { %v2828_v25 = vld [vmem:[#allocation2 + $0x224] ss:$16 sps:$4 sm:$0xff]   ;;  %v2831_v27 = vld [vmem:[#allocation2 + $0x220] ss:$16 sps:$4 sm:$0xff]  }
  0x2b   :  { %1630 = vmatpush1.bf16.msra.mxu0 %v2812_v14  ;;  %v2832_v28 = vld [vmem:[#allocation2 + $0x4] ss:$16 sps:$4 sm:$0xff]   ;;  %v2836_v30 = vld [vmem:[#allocation2] ss:$16 sps:$4 sm:$0xff]  }
  0x2c   :  { %1671 = vmatpush1.bf16.msra.mxu1 %v2813_v15  ;;  %1631 = vmatprep.subr.bf16.mxu0 %v2814_v16  ;;  %v2834_v29 = vld [vmem:[#allocation2 + $0x204] ss:$16 sps:$4 sm:$0xff]   ;;  %v2837_v31 = vld [vmem:[#allocation2 + $0x200] ss:$16 sps:$4 sm:$0xff]  }
  0x2d   :  { %1672 = vmatprep.subr.bf16.mxu1 %v2816_v17  ;;  %v2838_v32 = vld [vmem:[#allocation2 + $0x1e4] ss:$16 sps:$4 sm:$0xff]   ;;  %v2842_v34 = vld [vmem:[#allocation2 + $0x1e0] ss:$16 sps:$4 sm:$0xff]  }
  0x2e   :  { %v2840_v33 = vld [vmem:[#allocation2 + $0x3e4] ss:$16 sps:$4 sm:$0xff]   ;;  %v2843_v35 = vld [vmem:[#allocation2 + $0x3e0] ss:$16 sps:$4 sm:$0xff]  }
  0x2f   :  { %1632 = vmatpush1.bf16.msra.mxu0 %v2818_v18  ;;  %v2844_v36 = vld [vmem:[#allocation2 + $0x1c4] ss:$16 sps:$4 sm:$0xff]   ;;  %v2848_v38 = vld [vmem:[#allocation2 + $0x1c0] ss:$16 sps:$4 sm:$0xff]  }
  0x30   :  { %1673 = vmatpush1.bf16.msra.mxu1 %v2819_v19  ;;  %1633 = vmatprep.subr.bf16.mxu0 %v2820_v20  ;;  %v2846_v37 = vld [vmem:[#allocation2 + $0x3c4] ss:$16 sps:$4 sm:$0xff]   ;;  %v2849_v39 = vld [vmem:[#allocation2 + $0x3c0] ss:$16 sps:$4 sm:$0xff]  }
  0x31   :  { %1674 = vmatprep.subr.bf16.mxu1 %v2822_v21  ;;  %v2850_v40 = vld [vmem:[#allocation2 + $0x1a4] ss:$16 sps:$4 sm:$0xff]   ;;  %v2854_v42 = vld [vmem:[#allocation2 + $0x1a0] ss:$16 sps:$4 sm:$0xff]  }
  0x32   :  { %v2852_v41 = vld [vmem:[#allocation2 + $0x3a4] ss:$16 sps:$4 sm:$0xff]   ;;  %v2855_v43 = vld [vmem:[#allocation2 + $0x3a0] ss:$16 sps:$4 sm:$0xff]  }
  0x33   :  { %1634 = vmatpush1.bf16.msra.mxu0 %v2824_v22  ;;  %v2856_v44 = vld [vmem:[#allocation2 + $0x184] ss:$16 sps:$4 sm:$0xff]   ;;  %v2860_v47 = vld [vmem:[#allocation2 + $0x180] ss:$16 sps:$4 sm:$0xff]  }
  0x34   :  { %1675 = vmatpush1.bf16.msra.mxu1 %v2825_v23  ;;  %1635 = vmatprep.subr.bf16.mxu0 %v2826_v24  ;;  %v2858_v45 = vld [vmem:[#allocation2 + $0x384] ss:$16 sps:$4 sm:$0xff]   ;;  %v2861_v48 = vld [vmem:[#allocation2 + $0x380] ss:$16 sps:$4 sm:$0xff]  }
  0x35   :  { %1676 = vmatprep.subr.bf16.mxu1 %v2828_v25  ;;  %v2862_v51 = vld [vmem:[#allocation2 + $0x164] ss:$16 sps:$4 sm:$0xff]   ;;  %v2866_v54 = vld [vmem:[#allocation2 + $0x160] ss:$16 sps:$4 sm:$0xff]  }
  0x36   :  { %v2864_v53 = vld [vmem:[#allocation2 + $0x364] ss:$16 sps:$4 sm:$0xff]   ;;  %v2867_v55 = vld [vmem:[#allocation2 + $0x360] ss:$16 sps:$4 sm:$0xff]  }
  0x37   :  { %1636 = vmatpush1.bf16.msra.mxu0 %v2830_v26  ;;  %v2868_v56 = vld [vmem:[#allocation2 + $0x144] ss:$16 sps:$4 sm:$0xff]   ;;  %v2872_v58 = vld [vmem:[#allocation2 + $0x140] ss:$16 sps:$4 sm:$0xff]  }
  0x38   :  { %1677 = vmatpush1.bf16.msra.mxu1 %v2831_v27  ;;  %1637 = vmatprep.subr.bf16.mxu0 %v2832_v28  ;;  %v2870_v57 = vld [vmem:[#allocation2 + $0x344] ss:$16 sps:$4 sm:$0xff]   ;;  %v2873_v59 = vld [vmem:[#allocation2 + $0x340] ss:$16 sps:$4 sm:$0xff]  }
  0x39   :  { %1678 = vmatprep.subr.bf16.mxu1 %v2834_v29  ;;  %v2874_v60 = vld [vmem:[#allocation2 + $0x124] ss:$16 sps:$4 sm:$0xff]   ;;  %v2878_v62 = vld [vmem:[#allocation2 + $0x120] ss:$16 sps:$4 sm:$0xff]  }
  0x3a   :  { %v2876_v61 = vld [vmem:[#allocation2 + $0x324] ss:$16 sps:$4 sm:$0xff]   ;;  %v2879_v63 = vld [vmem:[#allocation2 + $0x320] ss:$16 sps:$4 sm:$0xff]  }
  0x3b   :  { %1638 = vmatpush1.bf16.msra.mxu0 %v2836_v30  ;;  %v2880_v0 = vld [vmem:[#allocation2 + $0x104] ss:$16 sps:$4 sm:$0xff]   ;;  %v2884_v2 = vld [vmem:[#allocation2 + $0x100] ss:$16 sps:$4 sm:$0xff]  }
  0x3c   :  { %1679 = vmatpush1.bf16.msra.mxu1 %v2837_v31  ;;  %1639 = vmatprep.subr.bf16.mxu0 %v2838_v32  ;;  %v2882_v1 = vld [vmem:[#allocation2 + $0x304] ss:$16 sps:$4 sm:$0xff]   ;;  %v2885_v3 = vld [vmem:[#allocation2 + $0x300] ss:$16 sps:$4 sm:$0xff]  }
  0x3d   :  { %1680 = vmatprep.subr.bf16.mxu1 %v2840_v33  ;;  %v49_v4 = vld [vmem:[%s3476_s0] sm:$0xff]  ;;  %v51_v5 = vld [vmem:[%s3476_s0 + $0x10] sm:$0xff] }
  0x3e   :  { %v2888_v6 = vld [vmem:[#allocation2 + $0x4e4] ss:$16 sps:$4 sm:$0xff]   ;;  %v3397_v8 = vpack.c.bf16 %v49_v4, %v49_v4  ;;  %v3399_v9 = vpack.c.bf16 %v51_v5, %v51_v5  ;;  %v2886_v10 = vld [vmem:[#allocation2 + $0x4e0] ss:$16 sps:$4 sm:$0xff]  }
  0x3f   :  { %1640 = vmatpush2.bf16.msra.mxu0 %v2842_v34  ;;  %v2891_v7 = vld [vmem:[#allocation2 + $0x6e4] ss:$16 sps:$4 sm:$0xff]   ;;  %v2889_v11 = vld [vmem:[#allocation2 + $0x6e0] ss:$16 sps:$4 sm:$0xff]   ;;  %v54_v34 = vld [vmem:[%s3476_s0 + $0x28] sm:$0xff] }
  0x40   :  { %1681 = vmatpush2.bf16.msra.mxu1 %v2843_v35  ;;  %1641 = vmatprep.subr.bf16.mxu0 %v2844_v36  ;;  %v2894_v12 = vld [vmem:[#allocation2 + $0x4c4] ss:$16 sps:$4 sm:$0xff]   ;;  %v2892_v14 = vld [vmem:[#allocation2 + $0x4c0] ss:$16 sps:$4 sm:$0xff]  }
  0x41   :  { %1682 = vmatprep.subr.bf16.mxu1 %v2846_v37  ;;  %v2897_v13 = vld [vmem:[#allocation2 + $0x6c4] ss:$16 sps:$4 sm:$0xff]   ;;  %v2895_v15 = vld [vmem:[#allocation2 + $0x6c0] ss:$16 sps:$4 sm:$0xff]   ;;  %v3406_v37 = vpack.c.bf16 %v54_v34, %v54_v34  ;;  %v3000_v34 = vld [vmem:[#allocation2 + $0x88] ss:$16 sps:$4 sm:$0xff]  }
  0x42   :  { %v2900_v16 = vld [vmem:[#allocation2 + $0x4a4] ss:$16 sps:$4 sm:$0xff]   ;;  %v2898_v18 = vld [vmem:[#allocation2 + $0x4a0] ss:$16 sps:$4 sm:$0xff]  }
  0x43   :  { %1642 = vmatpush2.bf16.msra.mxu0 %v2848_v38  ;;  %v2903_v17 = vld [vmem:[#allocation2 + $0x6a4] ss:$16 sps:$4 sm:$0xff]   ;;  %v2901_v19 = vld [vmem:[#allocation2 + $0x6a0] ss:$16 sps:$4 sm:$0xff]   ;;  %v56_v38 = vld [vmem:[%s3476_s0 + $0x38] sm:$0xff] }
  0x44   :  { %1683 = vmatpush2.bf16.msra.mxu1 %v2849_v39  ;;  %1643 = vmatprep.subr.bf16.mxu0 %v2850_v40  ;;  %v2906_v20 = vld [vmem:[#allocation2 + $0x484] ss:$16 sps:$4 sm:$0xff]   ;;  %v2904_v22 = vld [vmem:[#allocation2 + $0x480] ss:$16 sps:$4 sm:$0xff]   ;;  %v3411_v40 = vpack.c.bf16 %v56_v38, %v56_v38  ;;  %v3011_v38 = vld [vmem:[#allocation2 + $0x26c] ss:$16 sps:$4 sm:$0xff]  }
  0x45   :  { %1684 = vmatprep.subr.bf16.mxu1 %v2852_v41  ;;  %v2909_v21 = vld [vmem:[#allocation2 + $0x684] ss:$16 sps:$4 sm:$0xff]   ;;  %v2907_v23 = vld [vmem:[#allocation2 + $0x680] ss:$16 sps:$4 sm:$0xff]  }
  0x46   :  { %v2912_v24 = vld [vmem:[#allocation2 + $0x464] ss:$16 sps:$4 sm:$0xff]   ;;  %v2910_v26 = vld [vmem:[#allocation2 + $0x460] ss:$16 sps:$4 sm:$0xff]  }
  0x47   :  { %1644 = vmatpush2.bf16.msra.mxu0 %v2854_v42  ;;  %v2915_v25 = vld [vmem:[#allocation2 + $0x664] ss:$16 sps:$4 sm:$0xff]   ;;  %v2913_v27 = vld [vmem:[#allocation2 + $0x660] ss:$16 sps:$4 sm:$0xff]  }
  0x48   :  { %1685 = vmatpush2.bf16.msra.mxu1 %v2855_v43  ;;  %1645 = vmatprep.subr.bf16.mxu0 %v2856_v44  ;;  %v2918_v28 = vld [vmem:[#allocation2 + $0x444] ss:$16 sps:$4 sm:$0xff]   ;;  %v2916_v30 = vld [vmem:[#allocation2 + $0x440] ss:$16 sps:$4 sm:$0xff]  }
  0x49   :  { %1686 = vmatprep.subr.bf16.mxu1 %v2858_v45  ;;  %v2921_v29 = vld [vmem:[#allocation2 + $0x644] ss:$16 sps:$4 sm:$0xff]   ;;  %v2919_v31 = vld [vmem:[#allocation2 + $0x640] ss:$16 sps:$4 sm:$0xff]  }
  0x4a   :  { %v2924_v32 = vld [vmem:[#allocation2 + $0x424] ss:$16 sps:$4 sm:$0xff]   ;;  %v2922_v35 = vld [vmem:[#allocation2 + $0x420] ss:$16 sps:$4 sm:$0xff]  }
  0x4b   :  { %1646 = vmatpush2.bf16.msra.mxu0 %v2860_v47  ;;  %v2927_v33 = vld [vmem:[#allocation2 + $0x624] ss:$16 sps:$4 sm:$0xff]   ;;  %v2925_v36 = vld [vmem:[#allocation2 + $0x620] ss:$16 sps:$4 sm:$0xff]  }
  0x4c   :  { %1687 = vmatpush2.bf16.msra.mxu1 %v2861_v48  ;;  %1647 = vmatprep.subr.bf16.mxu0 %v2862_v51  ;;  %v2930_v39 = vld [vmem:[#allocation2 + $0x404] ss:$16 sps:$4 sm:$0xff]   ;;  %v2928_v42 = vld [vmem:[#allocation2 + $0x400] ss:$16 sps:$4 sm:$0xff]  }
  0x4d   :  { %1688 = vmatprep.subr.bf16.mxu1 %v2864_v53  ;;  %v2933_v41 = vld [vmem:[#allocation2 + $0x604] ss:$16 sps:$4 sm:$0xff]   ;;  %v2931_v43 = vld [vmem:[#allocation2 + $0x600] ss:$16 sps:$4 sm:$0xff]  }
  0x4e   :  { %v2936_v44 = vld [vmem:[#allocation2 + $0x5e4] ss:$16 sps:$4 sm:$0xff]   ;;  %v2934_v46 = vld [vmem:[#allocation2 + $0x5e0] ss:$16 sps:$4 sm:$0xff]  }
  0x4f   :  { %1648 = vmatpush2.bf16.msra.mxu0 %v2866_v54  ;;  %v2939_v45 = vld [vmem:[#allocation2 + $0x7e4] ss:$16 sps:$4 sm:$0xff]   ;;  %v2937_v47 = vld [vmem:[#allocation2 + $0x7e0] ss:$16 sps:$4 sm:$0xff]  }
  0x50   :  { %1689 = vmatpush2.bf16.msra.mxu1 %v2867_v55  ;;  %1649 = vmatprep.subr.bf16.mxu0 %v2868_v56  ;;  %v2942_v48 = vld [vmem:[#allocation2 + $0x5c4] ss:$16 sps:$4 sm:$0xff]   ;;  %v2940_v51 = vld [vmem:[#allocation2 + $0x5c0] ss:$16 sps:$4 sm:$0xff]  }
  0x51   :  { %1690 = vmatprep.subr.bf16.mxu1 %v2870_v57  ;;  %v2945_v50 = vld [vmem:[#allocation2 + $0x7c4] ss:$16 sps:$4 sm:$0xff]   ;;  %v2943_v53 = vld [vmem:[#allocation2 + $0x7c0] ss:$16 sps:$4 sm:$0xff]  }
  0x52   :  { %v2948_v54 = vld [vmem:[#allocation2 + $0x5a4] ss:$16 sps:$4 sm:$0xff]   ;;  %v2946_v56 = vld [vmem:[#allocation2 + $0x5a0] ss:$16 sps:$4 sm:$0xff]  }
  0x53   :  { %1650 = vmatpush2.bf16.msra.mxu0 %v2872_v58  ;;  %v2951_v55 = vld [vmem:[#allocation2 + $0x7a4] ss:$16 sps:$4 sm:$0xff]   ;;  %v2949_v57 = vld [vmem:[#allocation2 + $0x7a0] ss:$16 sps:$4 sm:$0xff]  }
  0x54   :  { %1691 = vmatpush2.bf16.msra.mxu1 %v2873_v59  ;;  %1651 = vmatprep.subr.bf16.mxu0 %v2874_v60  ;;  %v2954_v58 = vld [vmem:[#allocation2 + $0x584] ss:$16 sps:$4 sm:$0xff]   ;;  %v2952_v60 = vld [vmem:[#allocation2 + $0x580] ss:$16 sps:$4 sm:$0xff]  }
  0x55   :  { %1692 = vmatprep.subr.bf16.mxu1 %v2876_v61  ;;  %v2957_v59 = vld [vmem:[#allocation2 + $0x784] ss:$16 sps:$4 sm:$0xff]   ;;  %v2955_v61 = vld [vmem:[#allocation2 + $0x780] ss:$16 sps:$4 sm:$0xff]  }
  0x56   :  { %v2964_v4 = vld [vmem:[#allocation2 + $0x540] ss:$16 sps:$4 sm:$0xff]  }
  0x57   :  { %1652 = vmatpush2.bf16.msra.mxu0 %v2878_v62  ;;  %v2960_v62 = vld [vmem:[#allocation2 + $0x564] ss:$16 sps:$4 sm:$0xff]   ;;  %v2967_v5 = vld [vmem:[#allocation2 + $0x740] ss:$16 sps:$4 sm:$0xff]  }
  0x58   :  { %1693 = vmatpush2.bf16.msra.mxu1 %v2879_v63  ;;  %1653 = vmatprep.subr.bf16.mxu0 %v2880_v0  ;;  %v2963_v63 = vld [vmem:[#allocation2 + $0x764] ss:$16 sps:$4 sm:$0xff]   ;;  %v2958_v0 = vld [vmem:[#allocation2 + $0x560] ss:$16 sps:$4 sm:$0xff]  }
  0x59   :  { %1694 = vmatprep.subr.bf16.mxu1 %v2882_v1  ;;  %v2961_v1 = vld [vmem:[#allocation2 + $0x760] ss:$16 sps:$4 sm:$0xff]  }
  0x5b   :  { %1654 = vmatpush2.bf16.msra.mxu0 %v2884_v2  ;;  %v2966_v2 = vld [vmem:[#allocation2 + $0x544] ss:$16 sps:$4 sm:$0xff]  }
  0x5c   :  { %1695 = vmatpush2.bf16.msra.mxu1 %v2885_v3  ;;  %1705 = vmatprep.subr.bf16.mxu0 %v2888_v6  ;;  %v2969_v3 = vld [vmem:[#allocation2 + $0x744] ss:$16 sps:$4 sm:$0xff]  }
  0x5d   :  { %1746 = vmatprep.subr.bf16.mxu1 %v2891_v7  ;;  %v2972_v6 = vld [vmem:[#allocation2 + $0x524] ss:$16 sps:$4 sm:$0xff]  }
  0x5e   :  { %1656 = vmatmul.mubr.bf16.vlgmr.msra.gmra.mxu0 %v3397_v8  ;;  %v2975_v7 = vld [vmem:[#allocation2 + $0x724] ss:$16 sps:$4 sm:$0xff]  }
  0x5f   :  { %1697 = vmatmul.mubr.bf16.vlgmr.msra.gmra.mxu1 %v3399_v9  ;;  %1706 = vmatpush1.bf16.msra.mxu0 %v2886_v10  ;;  %v2970_v10 = vld [vmem:[#allocation2 + $0x520] ss:$16 sps:$4 sm:$0xff]  }
  0x60   :  { %1747 = vmatpush1.bf16.msra.mxu1 %v2889_v11  ;;  %1707 = vmatprep.subr.bf16.mxu0 %v2894_v12  ;;  %v2973_v11 = vld [vmem:[#allocation2 + $0x720] ss:$16 sps:$4 sm:$0xff]   ;;  %v2978_v12 = vld [vmem:[#allocation2 + $0x504] ss:$16 sps:$4 sm:$0xff]  }
  0x61   :  { %1748 = vmatprep.subr.bf16.mxu1 %v2897_v13  ;;  %1737 = vmatprep.mubr.bf16.mxu0 %v3406_v37  ;;  %v2981_v13 = vld [vmem:[#allocation2 + $0x704] ss:$16 sps:$4 sm:$0xff]  }
  0x62   :  { %1778 = vmatprep.mubr.bf16.mxu1 %v3411_v40 }
  0x63   :  { %1708 = vmatpush1.bf16.msra.mxu0 %v2892_v14  ;;  %v2976_v14 = vld [vmem:[#allocation2 + $0x500] ss:$16 sps:$4 sm:$0xff]  }
  0x64   :  { %1749 = vmatpush1.bf16.msra.mxu1 %v2895_v15  ;;  %1709 = vmatprep.subr.bf16.mxu0 %v2900_v16  ;;  %v2979_v15 = vld [vmem:[#allocation2 + $0x700] ss:$16 sps:$4 sm:$0xff]  }
  0x65   :  { %1750 = vmatprep.subr.bf16.mxu1 %v2903_v17  ;;  %v53_v16 = vld [vmem:[%s3476_s0 + $0x20] sm:$0xff]  ;;  %v55_v17 = vld [vmem:[%s3476_s0 + $0x30] sm:$0xff] }
  0x67   :  { %1710 = vmatpush1.bf16.msra.mxu0 %v2898_v18  ;;  %v2984_v18 = vld [vmem:[#allocation2 + $0xec] ss:$16 sps:$4 sm:$0xff]  }
  0x68   :  { %1751 = vmatpush1.bf16.msra.mxu1 %v2901_v19  ;;  %1711 = vmatprep.subr.bf16.mxu0 %v2906_v20  ;;  %v2987_v19 = vld [vmem:[#allocation2 + $0x2ec] ss:$16 sps:$4 sm:$0xff]   ;;  %v3421_v20 = vpack.c.bf16 %v53_v16, %v53_v16 }
  0x69   :  { %1752 = vmatprep.subr.bf16.mxu1 %v2909_v21  ;;  %v3423_v21 = vpack.c.bf16 %v55_v17, %v55_v17  ;;  %v3068_v16 = vld [vmem:[#allocation2 + $0x12c] ss:$16 sps:$4 sm:$0xff]  }
  0x6a   :  { %v3071_v17 = vld [vmem:[#allocation2 + $0x32c] ss:$16 sps:$4 sm:$0xff]  }
  0x6b   :  { %1712 = vmatpush1.bf16.msra.mxu0 %v2904_v22  ;;  %v2982_v22 = vld [vmem:[#allocation2 + $0xe8] ss:$16 sps:$4 sm:$0xff]  }
  0x6c   :  { %1753 = vmatpush1.bf16.msra.mxu1 %v2907_v23  ;;  %1713 = vmatprep.subr.bf16.mxu0 %v2912_v24  ;;  %v2985_v23 = vld [vmem:[#allocation2 + $0x2e8] ss:$16 sps:$4 sm:$0xff]   ;;  %v2990_v24 = vld [vmem:[#allocation2 + $0xcc] ss:$16 sps:$4 sm:$0xff]  }
  0x6d   :  { %1754 = vmatprep.subr.bf16.mxu1 %v2915_v25  ;;  %v2993_v25 = vld [vmem:[#allocation2 + $0x2cc] ss:$16 sps:$4 sm:$0xff]  }
  0x6f   :  { %1714 = vmatpush1.bf16.msra.mxu0 %v2910_v26  ;;  %v2988_v26 = vld [vmem:[#allocation2 + $0xc8] ss:$16 sps:$4 sm:$0xff]  }
  0x70   :  { %1755 = vmatpush1.bf16.msra.mxu1 %v2913_v27  ;;  %1715 = vmatprep.subr.bf16.mxu0 %v2918_v28  ;;  %v2991_v27 = vld [vmem:[#allocation2 + $0x2c8] ss:$16 sps:$4 sm:$0xff]   ;;  %v2996_v28 = vld [vmem:[#allocation2 + $0xac] ss:$16 sps:$4 sm:$0xff]  }
  0x71   :  { %1756 = vmatprep.subr.bf16.mxu1 %v2921_v29  ;;  %v2999_v29 = vld [vmem:[#allocation2 + $0x2ac] ss:$16 sps:$4 sm:$0xff]  }
  0x73   :  { %1716 = vmatpush1.bf16.msra.mxu0 %v2916_v30  ;;  %v2994_v30 = vld [vmem:[#allocation2 + $0xa8] ss:$16 sps:$4 sm:$0xff]  }
  0x74   :  { %1757 = vmatpush1.bf16.msra.mxu1 %v2919_v31  ;;  %1717 = vmatprep.subr.bf16.mxu0 %v2924_v32  ;;  %v2997_v31 = vld [vmem:[#allocation2 + $0x2a8] ss:$16 sps:$4 sm:$0xff]   ;;  %v3002_v32 = vld [vmem:[#allocation2 + $0x8c] ss:$16 sps:$4 sm:$0xff]  }
  0x75   :  { %1758 = vmatprep.subr.bf16.mxu1 %v2927_v33  ;;  %v3005_v33 = vld [vmem:[#allocation2 + $0x28c] ss:$16 sps:$4 sm:$0xff]  }
  0x77   :  { %1718 = vmatpush1.bf16.msra.mxu0 %v2922_v35  ;;  %v3003_v35 = vld [vmem:[#allocation2 + $0x288] ss:$16 sps:$4 sm:$0xff]  }
  0x78   :  { %1759 = vmatpush1.bf16.msra.mxu1 %v2925_v36  ;;  %1719 = vmatprep.subr.bf16.mxu0 %v2930_v39  ;;  %v3008_v36 = vld [vmem:[#allocation2 + $0x6c] ss:$16 sps:$4 sm:$0xff]   ;;  %v3006_v39 = vld [vmem:[#allocation2 + $0x68] ss:$16 sps:$4 sm:$0xff]  }
  0x79   :  { %1760 = vmatprep.subr.bf16.mxu1 %v2933_v41  ;;  %v3017_v41 = vld [vmem:[#allocation2 + $0x24c] ss:$16 sps:$4 sm:$0xff]  }
  0x7b   :  { %1720 = vmatpush1.bf16.msra.mxu0 %v2928_v42  ;;  %v3012_v42 = vld [vmem:[#allocation2 + $0x48] ss:$16 sps:$4 sm:$0xff]  }
  0x7c   :  { %1761 = vmatpush1.bf16.msra.mxu1 %v2931_v43  ;;  %1721 = vmatprep.subr.bf16.mxu0 %v2936_v44  ;;  %v3015_v43 = vld [vmem:[#allocation2 + $0x248] ss:$16 sps:$4 sm:$0xff]   ;;  %v3020_v44 = vld [vmem:[#allocation2 + $0x2c] ss:$16 sps:$4 sm:$0xff]  }
  0x7d   :  { %1762 = vmatprep.subr.bf16.mxu1 %v2939_v45  ;;  %v3023_v45 = vld [vmem:[#allocation2 + $0x22c] ss:$16 sps:$4 sm:$0xff]  }
  0x7f   :  { %1722 = vmatpush2.bf16.msra.mxu0 %v2934_v46  ;;  %v3018_v46 = vld [vmem:[#allocation2 + $0x28] ss:$16 sps:$4 sm:$0xff]  }
  0x80   :  { %1763 = vmatpush2.bf16.msra.mxu1 %v2937_v47  ;;  %1723 = vmatprep.subr.bf16.mxu0 %v2942_v48  ;;  %v3021_v47 = vld [vmem:[#allocation2 + $0x228] ss:$16 sps:$4 sm:$0xff]   ;;  %v3026_v48 = vld [vmem:[#allocation2 + $0xc] ss:$16 sps:$4 sm:$0xff]  }
  0x81   :  { %1764 = vmatprep.subr.bf16.mxu1 %v2945_v50  ;;  %v3029_v50 = vld [vmem:[#allocation2 + $0x20c] ss:$16 sps:$4 sm:$0xff]  }
  0x83   :  { %1724 = vmatpush2.bf16.msra.mxu0 %v2940_v51  ;;  %v3024_v51 = vld [vmem:[#allocation2 + $0x8] ss:$16 sps:$4 sm:$0xff]  }
  0x84   :  { %1765 = vmatpush2.bf16.msra.mxu1 %v2943_v53  ;;  %1725 = vmatprep.subr.bf16.mxu0 %v2948_v54  ;;  %v3027_v53 = vld [vmem:[#allocation2 + $0x208] ss:$16 sps:$4 sm:$0xff]   ;;  %v3032_v54 = vld [vmem:[#allocation2 + $0x1ec] ss:$16 sps:$4 sm:$0xff]  }
  0x85   :  { %1766 = vmatprep.subr.bf16.mxu1 %v2951_v55  ;;  %v3035_v55 = vld [vmem:[#allocation2 + $0x3ec] ss:$16 sps:$4 sm:$0xff]  }
  0x87   :  { %1726 = vmatpush2.bf16.msra.mxu0 %v2946_v56  ;;  %v3030_v56 = vld [vmem:[#allocation2 + $0x1e8] ss:$16 sps:$4 sm:$0xff]  }
  0x88   :  { %1767 = vmatpush2.bf16.msra.mxu1 %v2949_v57  ;;  %1727 = vmatprep.subr.bf16.mxu0 %v2954_v58  ;;  %v3033_v57 = vld [vmem:[#allocation2 + $0x3e8] ss:$16 sps:$4 sm:$0xff]   ;;  %v3038_v58 = vld [vmem:[#allocation2 + $0x1cc] ss:$16 sps:$4 sm:$0xff]  }
  0x89   :  { %1768 = vmatprep.subr.bf16.mxu1 %v2957_v59  ;;  %v3041_v59 = vld [vmem:[#allocation2 + $0x3cc] ss:$16 sps:$4 sm:$0xff]  }
  0x8b   :  { %1728 = vmatpush2.bf16.msra.mxu0 %v2952_v60  ;;  %v3036_v60 = vld [vmem:[#allocation2 + $0x1c8] ss:$16 sps:$4 sm:$0xff]  }
  0x8c   :  { %1769 = vmatpush2.bf16.msra.mxu1 %v2955_v61  ;;  %1729 = vmatprep.subr.bf16.mxu0 %v2960_v62  ;;  %v3039_v61 = vld [vmem:[#allocation2 + $0x3c8] ss:$16 sps:$4 sm:$0xff]   ;;  %v3044_v62 = vld [vmem:[#allocation2 + $0x1ac] ss:$16 sps:$4 sm:$0xff]  }
  0x8d   :  { %1770 = vmatprep.subr.bf16.mxu1 %v2963_v63  ;;  %v3047_v63 = vld [vmem:[#allocation2 + $0x3ac] ss:$16 sps:$4 sm:$0xff]  }
  0x8f   :  { %1730 = vmatpush2.bf16.msra.mxu0 %v2958_v0  ;;  %v3042_v0 = vld [vmem:[#allocation2 + $0x1a8] ss:$16 sps:$4 sm:$0xff]  }
  0x90   :  { %1771 = vmatpush2.bf16.msra.mxu1 %v2961_v1  ;;  %1731 = vmatprep.subr.bf16.mxu0 %v2966_v2  ;;  %v3045_v1 = vld [vmem:[#allocation2 + $0x3a8] ss:$16 sps:$4 sm:$0xff]   ;;  %v3050_v2 = vld [vmem:[#allocation2 + $0x18c] ss:$16 sps:$4 sm:$0xff]  }
  0x91   :  { %1772 = vmatprep.subr.bf16.mxu1 %v2969_v3  ;;  %v3053_v3 = vld [vmem:[#allocation2 + $0x38c] ss:$16 sps:$4 sm:$0xff]  }
  0x93   :  { %1732 = vmatpush2.bf16.msra.mxu0 %v2964_v4  ;;  %v3048_v4 = vld [vmem:[#allocation2 + $0x188] ss:$16 sps:$4 sm:$0xff]  }
  0x94   :  { %1773 = vmatpush2.bf16.msra.mxu1 %v2967_v5  ;;  %1733 = vmatprep.subr.bf16.mxu0 %v2972_v6  ;;  %v3051_v5 = vld [vmem:[#allocation2 + $0x388] ss:$16 sps:$4 sm:$0xff]   ;;  %v3056_v6 = vld [vmem:[#allocation2 + $0x16c] ss:$16 sps:$4 sm:$0xff]  }
  0x95   :  { %1774 = vmatprep.subr.bf16.mxu1 %v2975_v7  ;;  %v3059_v7 = vld [vmem:[#allocation2 + $0x36c] ss:$16 sps:$4 sm:$0xff]  }
  0x97   :  { %1734 = vmatpush2.bf16.msra.mxu0 %v2970_v10  ;;  %v3054_v10 = vld [vmem:[#allocation2 + $0x168] ss:$16 sps:$4 sm:$0xff]  }
  0x98   :  { %1775 = vmatpush2.bf16.msra.mxu1 %v2973_v11  ;;  %1735 = vmatprep.subr.bf16.mxu0 %v2978_v12  ;;  %v3057_v11 = vld [vmem:[#allocation2 + $0x368] ss:$16 sps:$4 sm:$0xff]   ;;  %v3062_v12 = vld [vmem:[#allocation2 + $0x14c] ss:$16 sps:$4 sm:$0xff]  }
  0x99   :  { %1776 = vmatprep.subr.bf16.mxu1 %v2981_v13  ;;  %v3065_v13 = vld [vmem:[#allocation2 + $0x34c] ss:$16 sps:$4 sm:$0xff]  }
  0x9b   :  { %1736 = vmatpush2.bf16.msra.mxu0 %v2976_v14  ;;  %v3060_v14 = vld [vmem:[#allocation2 + $0x148] ss:$16 sps:$4 sm:$0xff]  }
  0x9c   :  { %1777 = vmatpush2.bf16.msra.mxu1 %v2979_v15  ;;  %1787 = vmatprep.subr.bf16.mxu0 %v2984_v18  ;;  %v3063_v15 = vld [vmem:[#allocation2 + $0x348] ss:$16 sps:$4 sm:$0xff]  }
  0x9d   :  { %1828 = vmatprep.subr.bf16.mxu1 %v2987_v19  ;;  %v3066_v18 = vld [vmem:[#allocation2 + $0x128] ss:$16 sps:$4 sm:$0xff]  }
  0x9e   :  { %1738 = vmatmul.mubr.bf16.vlgmr.msra.gmra.mxu0 %v3421_v20  ;;  %v3069_v19 = vld [vmem:[#allocation2 + $0x328] ss:$16 sps:$4 sm:$0xff]  }
  0x9f   :  { %1779 = vmatmul.mubr.bf16.vlgmr.msra.gmra.mxu1 %v3423_v21  ;;  %1788 = vmatpush1.bf16.msra.mxu0 %v2982_v22  ;;  %v3074_v22 = vld [vmem:[#allocation2 + $0x10c] ss:$16 sps:$4 sm:$0xff]  }
  0xa0   :  { %1829 = vmatpush1.bf16.msra.mxu1 %v2985_v23  ;;  %1789 = vmatprep.subr.bf16.mxu0 %v2990_v24  ;;  %v3077_v23 = vld [vmem:[#allocation2 + $0x30c] ss:$16 sps:$4 sm:$0xff]   ;;  %v3072_v24 = vld [vmem:[#allocation2 + $0x108] ss:$16 sps:$4 sm:$0xff]  }
  0xa1   :  { %1830 = vmatprep.subr.bf16.mxu1 %v2993_v25  ;;  %1819 = vmatprep.mubr.bf16.mxu0 %v3382_v49  ;;  %v3009_v49 = vld [vmem:[#allocation2 + $0x268] ss:$16 sps:$4 sm:$0xff]  }
  0xa2   :  { %1860 = vmatprep.mubr.bf16.mxu1 %v3387_v52  ;;  %v3014_v52 = vld [vmem:[#allocation2 + $0x4c] ss:$16 sps:$4 sm:$0xff]   ;;  %v3075_v25 = vld [vmem:[#allocation2 + $0x308] ss:$16 sps:$4 sm:$0xff]  }
  0xa3   :  { %1790 = vmatpush1.bf16.msra.mxu0 %v2988_v26  ;;  %v3080_v26 = vld [vmem:[#allocation2 + $0x4ec] ss:$16 sps:$4 sm:$0xff]  }
  0xa4   :  { %1831 = vmatpush1.bf16.msra.mxu1 %v2991_v27  ;;  %1791 = vmatprep.subr.bf16.mxu0 %v2996_v28  ;;  %v3083_v27 = vld [vmem:[#allocation2 + $0x6ec] ss:$16 sps:$4 sm:$0xff]   ;;  %v3078_v28 = vld [vmem:[#allocation2 + $0x4e8] ss:$16 sps:$4 sm:$0xff]  }
  0xa5   :  { %1832 = vmatprep.subr.bf16.mxu1 %v2999_v29  ;;  %v3081_v29 = vld [vmem:[#allocation2 + $0x6e8] ss:$16 sps:$4 sm:$0xff]  }
  0xa7   :  { %1792 = vmatpush1.bf16.msra.mxu0 %v2994_v30  ;;  %v3086_v30 = vld [vmem:[#allocation2 + $0x4cc] ss:$16 sps:$4 sm:$0xff]  }
  0xa8   :  { %1833 = vmatpush1.bf16.msra.mxu1 %v2997_v31  ;;  %1793 = vmatprep.subr.bf16.mxu0 %v3002_v32  ;;  %v3089_v31 = vld [vmem:[#allocation2 + $0x6cc] ss:$16 sps:$4 sm:$0xff]   ;;  %v3084_v32 = vld [vmem:[#allocation2 + $0x4c8] ss:$16 sps:$4 sm:$0xff]  }
  0xa9   :  { %1834 = vmatprep.subr.bf16.mxu1 %v3005_v33  ;;  %v3087_v33 = vld [vmem:[#allocation2 + $0x6c8] ss:$16 sps:$4 sm:$0xff]  }
  0xab   :  { %1794 = vmatpush1.bf16.msra.mxu0 %v3000_v34  ;;  %v3092_v34 = vld [vmem:[#allocation2 + $0x4ac] ss:$16 sps:$4 sm:$0xff]  }
  0xac   :  { %1835 = vmatpush1.bf16.msra.mxu1 %v3003_v35  ;;  %1795 = vmatprep.subr.bf16.mxu0 %v3008_v36  ;;  %v3095_v35 = vld [vmem:[#allocation2 + $0x6ac] ss:$16 sps:$4 sm:$0xff]   ;;  %v3090_v36 = vld [vmem:[#allocation2 + $0x4a8] ss:$16 sps:$4 sm:$0xff]  }
  0xad   :  { %1836 = vmatprep.subr.bf16.mxu1 %v3011_v38  ;;  %v3093_v38 = vld [vmem:[#allocation2 + $0x6a8] ss:$16 sps:$4 sm:$0xff]  }
  0xaf   :  { %1796 = vmatpush1.bf16.msra.mxu0 %v3006_v39  ;;  %v3098_v39 = vld [vmem:[#allocation2 + $0x48c] ss:$16 sps:$4 sm:$0xff]  }
  0xb0   :  { %1837 = vmatpush1.bf16.msra.mxu1 %v3009_v49  ;;  %1797 = vmatprep.subr.bf16.mxu0 %v3014_v52  ;;  %v3101_v49 = vld [vmem:[#allocation2 + $0x68c] ss:$16 sps:$4 sm:$0xff]  }
  0xb1   :  { %1838 = vmatprep.subr.bf16.mxu1 %v3017_v41  ;;  %v3104_v52 = vld [vmem:[#allocation2 + $0x46c] ss:$16 sps:$4 sm:$0xff]  }
  0xb2   :  { %v3107_v41 = vld [vmem:[#allocation2 + $0x66c] ss:$16 sps:$4 sm:$0xff]  }
  0xb3   :  { %1798 = vmatpush1.bf16.msra.mxu0 %v3012_v42  ;;  %v3102_v42 = vld [vmem:[#allocation2 + $0x468] ss:$16 sps:$4 sm:$0xff]  }
  0xb4   :  { %1839 = vmatpush1.bf16.msra.mxu1 %v3015_v43  ;;  %1799 = vmatprep.subr.bf16.mxu0 %v3020_v44  ;;  %v3113_v43 = vld [vmem:[#allocation2 + $0x64c] ss:$16 sps:$4 sm:$0xff]   ;;  %v3108_v44 = vld [vmem:[#allocation2 + $0x448] ss:$16 sps:$4 sm:$0xff]  }
  0xb5   :  { %1840 = vmatprep.subr.bf16.mxu1 %v3023_v45  ;;  %v3111_v45 = vld [vmem:[#allocation2 + $0x648] ss:$16 sps:$4 sm:$0xff]  }
  0xb7   :  { %1800 = vmatpush1.bf16.msra.mxu0 %v3018_v46  ;;  %v3116_v46 = vld [vmem:[#allocation2 + $0x42c] ss:$16 sps:$4 sm:$0xff]  }
  0xb8   :  { %1841 = vmatpush1.bf16.msra.mxu1 %v3021_v47  ;;  %1801 = vmatprep.subr.bf16.mxu0 %v3026_v48  ;;  %v3119_v47 = vld [vmem:[#allocation2 + $0x62c] ss:$16 sps:$4 sm:$0xff]   ;;  %v3114_v48 = vld [vmem:[#allocation2 + $0x428] ss:$16 sps:$4 sm:$0xff]  }
  0xb9   :  { %1842 = vmatprep.subr.bf16.mxu1 %v3029_v50  ;;  %v3117_v50 = vld [vmem:[#allocation2 + $0x628] ss:$16 sps:$4 sm:$0xff]  }
  0xbb   :  { %1802 = vmatpush1.bf16.msra.mxu0 %v3024_v51  ;;  %v3122_v51 = vld [vmem:[#allocation2 + $0x40c] ss:$16 sps:$4 sm:$0xff]  }
  0xbc   :  { %1843 = vmatpush1.bf16.msra.mxu1 %v3027_v53  ;;  %1803 = vmatprep.subr.bf16.mxu0 %v3032_v54  ;;  %v3125_v53 = vld [vmem:[#allocation2 + $0x60c] ss:$16 sps:$4 sm:$0xff]   ;;  %v3120_v54 = vld [vmem:[#allocation2 + $0x408] ss:$16 sps:$4 sm:$0xff]  }
  0xbd   :  { %1844 = vmatprep.subr.bf16.mxu1 %v3035_v55  ;;  %v3123_v55 = vld [vmem:[#allocation2 + $0x608] ss:$16 sps:$4 sm:$0xff]  }
  0xbf   :  { %1804 = vmatpush2.bf16.msra.mxu0 %v3030_v56  ;;  %v3128_v56 = vld [vmem:[#allocation2 + $0x5ec] ss:$16 sps:$4 sm:$0xff]  }
  0xc0   :  { %1845 = vmatpush2.bf16.msra.mxu1 %v3033_v57  ;;  %1805 = vmatprep.subr.bf16.mxu0 %v3038_v58  ;;  %v3131_v57 = vld [vmem:[#allocation2 + $0x7ec] ss:$16 sps:$4 sm:$0xff]   ;;  %v3126_v58 = vld [vmem:[#allocation2 + $0x5e8] ss:$16 sps:$4 sm:$0xff]  }
  0xc1   :  { %1846 = vmatprep.subr.bf16.mxu1 %v3041_v59  ;;  %v3129_v59 = vld [vmem:[#allocation2 + $0x7e8] ss:$16 sps:$4 sm:$0xff]  }
  0xc3   :  { %1806 = vmatpush2.bf16.msra.mxu0 %v3036_v60  ;;  %v3134_v60 = vld [vmem:[#allocation2 + $0x5cc] ss:$16 sps:$4 sm:$0xff]  }
  0xc4   :  { %1847 = vmatpush2.bf16.msra.mxu1 %v3039_v61  ;;  %1807 = vmatprep.subr.bf16.mxu0 %v3044_v62  ;;  %v3137_v61 = vld [vmem:[#allocation2 + $0x7cc] ss:$16 sps:$4 sm:$0xff]   ;;  %v3132_v62 = vld [vmem:[#allocation2 + $0x5c8] ss:$16 sps:$4 sm:$0xff]  }
  0xc5   :  { %1848 = vmatprep.subr.bf16.mxu1 %v3047_v63  ;;  %v3135_v63 = vld [vmem:[#allocation2 + $0x7c8] ss:$16 sps:$4 sm:$0xff]  }
  0xc7   :  { %1808 = vmatpush2.bf16.msra.mxu0 %v3042_v0  ;;  %v3140_v0 = vld [vmem:[#allocation2 + $0x5ac] ss:$16 sps:$4 sm:$0xff]  }
  0xc8   :  { %1849 = vmatpush2.bf16.msra.mxu1 %v3045_v1  ;;  %1809 = vmatprep.subr.bf16.mxu0 %v3050_v2  ;;  %v3143_v1 = vld [vmem:[#allocation2 + $0x7ac] ss:$16 sps:$4 sm:$0xff]   ;;  %v3138_v2 = vld [vmem:[#allocation2 + $0x5a8] ss:$16 sps:$4 sm:$0xff]  }
  0xc9   :  { %1850 = vmatprep.subr.bf16.mxu1 %v3053_v3  ;;  %v3141_v3 = vld [vmem:[#allocation2 + $0x7a8] ss:$16 sps:$4 sm:$0xff]  }
  0xcb   :  { %1810 = vmatpush2.bf16.msra.mxu0 %v3048_v4  ;;  %v3146_v4 = vld [vmem:[#allocation2 + $0x58c] ss:$16 sps:$4 sm:$0xff]  }
  0xcc   :  { %1851 = vmatpush2.bf16.msra.mxu1 %v3051_v5  ;;  %1811 = vmatprep.subr.bf16.mxu0 %v3056_v6  ;;  %v3149_v5 = vld [vmem:[#allocation2 + $0x78c] ss:$16 sps:$4 sm:$0xff]   ;;  %v3144_v6 = vld [vmem:[#allocation2 + $0x588] ss:$16 sps:$4 sm:$0xff]  }
  0xcd   :  { %1852 = vmatprep.subr.bf16.mxu1 %v3059_v7  ;;  %v3147_v7 = vld [vmem:[#allocation2 + $0x788] ss:$16 sps:$4 sm:$0xff]  }
  0xcf   :  { %1812 = vmatpush2.bf16.msra.mxu0 %v3054_v10  ;;  %v3152_v10 = vld [vmem:[#allocation2 + $0x56c] ss:$16 sps:$4 sm:$0xff]  }
  0xd0   :  { %1853 = vmatpush2.bf16.msra.mxu1 %v3057_v11  ;;  %1813 = vmatprep.subr.bf16.mxu0 %v3062_v12  ;;  %v3155_v11 = vld [vmem:[#allocation2 + $0x76c] ss:$16 sps:$4 sm:$0xff]   ;;  %v3150_v12 = vld [vmem:[#allocation2 + $0x568] ss:$16 sps:$4 sm:$0xff]  }
  0xd1   :  { %1854 = vmatprep.subr.bf16.mxu1 %v3065_v13  ;;  %v3153_v13 = vld [vmem:[#allocation2 + $0x768] ss:$16 sps:$4 sm:$0xff]  }
  0xd3   :  { %1814 = vmatpush2.bf16.msra.mxu0 %v3060_v14  ;;  %v3158_v14 = vld [vmem:[#allocation2 + $0x54c] ss:$16 sps:$4 sm:$0xff]  }
  0xd4   :  { %1855 = vmatpush2.bf16.msra.mxu1 %v3063_v15  ;;  %1815 = vmatprep.subr.bf16.mxu0 %v3068_v16  ;;  %v3161_v15 = vld [vmem:[#allocation2 + $0x74c] ss:$16 sps:$4 sm:$0xff]   ;;  %v3156_v16 = vld [vmem:[#allocation2 + $0x548] ss:$16 sps:$4 sm:$0xff]  }
  0xd5   :  { %1856 = vmatprep.subr.bf16.mxu1 %v3071_v17  ;;  %v3159_v17 = vld [vmem:[#allocation2 + $0x748] ss:$16 sps:$4 sm:$0xff]  }
  0xd7   :  { %1816 = vmatpush2.bf16.msra.mxu0 %v3066_v18  ;;  %v3164_v18 = vld [vmem:[#allocation2 + $0x52c] ss:$16 sps:$4 sm:$0xff]  }
  0xd8   :  { %1857 = vmatpush2.bf16.msra.mxu1 %v3069_v19  ;;  %1817 = vmatprep.subr.bf16.mxu0 %v3074_v22  ;;  %v3167_v19 = vld [vmem:[#allocation2 + $0x72c] ss:$16 sps:$4 sm:$0xff]   ;;  %v3162_v22 = vld [vmem:[#allocation2 + $0x528] ss:$16 sps:$4 sm:$0xff]  }
  0xd9   :  { %1858 = vmatprep.subr.bf16.mxu1 %v3077_v23  ;;  %v3165_v23 = vld [vmem:[#allocation2 + $0x728] ss:$16 sps:$4 sm:$0xff]  }
  0xdb   :  { %1818 = vmatpush2.bf16.msra.mxu0 %v3072_v24  ;;  %v3170_v24 = vld [vmem:[#allocation2 + $0x50c] ss:$16 sps:$4 sm:$0xff]  }
  0xdc   :  { %1859 = vmatpush2.bf16.msra.mxu1 %v3075_v25  ;;  %1869 = vmatprep.subr.bf16.mxu0 %v3080_v26  ;;  %v3173_v25 = vld [vmem:[#allocation2 + $0x70c] ss:$16 sps:$4 sm:$0xff]   ;;  %v3168_v26 = vld [vmem:[#allocation2 + $0x508] ss:$16 sps:$4 sm:$0xff]  }
  0xdd   :  { %1910 = vmatprep.subr.bf16.mxu1 %v3083_v27  ;;  %v3171_v27 = vld [vmem:[#allocation2 + $0x708] ss:$16 sps:$4 sm:$0xff]  }
  0xde   :  { %1820 = vmatmul.mubr.bf16.vlgmr.msra.gmra.mxu0 %v3397_v8  ;;  %v3096_v8 = vld [vmem:[#allocation2 + $0x488] ss:$16 sps:$4 sm:$0xff]  }
  0xdf   :  { %1861 = vmatmul.mubr.bf16.vlgmr.msra.gmra.mxu1 %v3399_v9  ;;  %1870 = vmatpush1.bf16.msra.mxu0 %v3078_v28  ;;  %v3099_v9 = vld [vmem:[#allocation2 + $0x688] ss:$16 sps:$4 sm:$0xff]   ;;  %v3176_v28 = vld [vmem:[#allocation5 + $0x74] ss:$8 sps:$4 sm:$0xff]  }
  0xe0   :  { %1911 = vmatpush1.bf16.msra.mxu1 %v3081_v29  ;;  %1871 = vmatprep.subr.bf16.mxu0 %v3086_v30  ;;  %v3174_v29 = vld [vmem:[#allocation5 + $0x70] ss:$8 sps:$4 sm:$0xff]   ;;  %v3179_v30 = vld [vmem:[#allocation5 + $0x64] ss:$8 sps:$4 sm:$0xff]  }
  0xe1   :  { %1912 = vmatprep.subr.bf16.mxu1 %v3089_v31  ;;  %1901 = vmatprep.mubr.bf16.mxu0 %v3406_v37  ;;  %v3105_v37 = vld [vmem:[#allocation2 + $0x668] ss:$16 sps:$4 sm:$0xff]  }
  0xe2   :  { %1942 = vmatprep.mubr.bf16.mxu1 %v3411_v40  ;;  %v3110_v40 = vld [vmem:[#allocation2 + $0x44c] ss:$16 sps:$4 sm:$0xff]  }
  0xe3   :  { %1872 = vmatpush1.bf16.msra.mxu0 %v3084_v32 }
  0xe4   :  { %1913 = vmatpush1.bf16.msra.mxu1 %v3087_v33  ;;  %1873 = vmatprep.subr.bf16.mxu0 %v3092_v34  ;;  %v3177_v33 = vld [vmem:[#allocation5 + $0x60] ss:$8 sps:$4 sm:$0xff]  }
  0xe5   :  { %1914 = vmatprep.subr.bf16.mxu1 %v3095_v35 }
  0xe7   :  { %1874 = vmatpush1.bf16.msra.mxu0 %v3090_v36  ;;  %v3182_v36 = vld [vmem:[#allocation5 + $0x54] ss:$8 sps:$4 sm:$0xff]  }
  0xe8   :  { %1915 = vmatpush1.bf16.msra.mxu1 %v3093_v38  ;;  %1875 = vmatprep.subr.bf16.mxu0 %v3098_v39 }
  0xe9   :  { %1916 = vmatprep.subr.bf16.mxu1 %v3101_v49  ;;  %v3180_v49 = vld [vmem:[#allocation5 + $0x50] ss:$8 sps:$4 sm:$0xff]  }
  0xeb   :  { %1876 = vmatpush1.bf16.msra.mxu0 %v3096_v8 }
  0xec   :  { %1917 = vmatpush1.bf16.msra.mxu1 %v3099_v9  ;;  %1877 = vmatprep.subr.bf16.mxu0 %v3104_v52  ;;  %v3185_v52 = vld [vmem:[#allocation5 + $0x44] ss:$8 sps:$4 sm:$0xff]  }
  0xed   :  { %1918 = vmatprep.subr.bf16.mxu1 %v3107_v41  ;;  %v3222_v41 = vld [vmem:[#allocation5 + $0x170] ss:$8 sps:$4 sm:$0xff]  }
  0xef   :  { %1878 = vmatpush1.bf16.msra.mxu0 %v3102_v42  ;;  %v3227_v42 = vld [vmem:[#allocation5 + $0x164] ss:$8 sps:$4 sm:$0xff]  }
  0xf0   :  { %1919 = vmatpush1.bf16.msra.mxu1 %v3105_v37  ;;  %1879 = vmatprep.subr.bf16.mxu0 %v3110_v40  ;;  %v3225_v37 = vld [vmem:[#allocation5 + $0x160] ss:$8 sps:$4 sm:$0xff]   ;;  %v3188_v40 = vld [vmem:[#allocation5 + $0x34] ss:$8 sps:$4 sm:$0xff]  }
  0xf1   :  { %1920 = vmatprep.subr.bf16.mxu1 %v3113_v43  ;;  %v3230_v43 = vld [vmem:[#allocation5 + $0x154] ss:$8 sps:$4 sm:$0xff]  }
  0xf3   :  { %1880 = vmatpush1.bf16.msra.mxu0 %v3108_v44  ;;  %v3186_v44 = vld [vmem:[#allocation5 + $0x30] ss:$8 sps:$4 sm:$0xff]  }
  0xf4   :  { %1921 = vmatpush1.bf16.msra.mxu1 %v3111_v45  ;;  %1881 = vmatprep.subr.bf16.mxu0 %v3116_v46  ;;  %v3228_v45 = vld [vmem:[#allocation5 + $0x150] ss:$8 sps:$4 sm:$0xff]   ;;  %v3191_v46 = vld [vmem:[#allocation5 + $0x24] ss:$8 sps:$4 sm:$0xff]  }
  0xf5   :  { %1922 = vmatprep.subr.bf16.mxu1 %v3119_v47  ;;  %v3233_v47 = vld [vmem:[#allocation5 + $0x144] ss:$8 sps:$4 sm:$0xff]  }
  0xf7   :  { %1882 = vmatpush1.bf16.msra.mxu0 %v3114_v48  ;;  %v3189_v48 = vld [vmem:[#allocation5 + $0x20] ss:$8 sps:$4 sm:$0xff]  }
  0xf8   :  { %1923 = vmatpush1.bf16.msra.mxu1 %v3117_v50  ;;  %1883 = vmatprep.subr.bf16.mxu0 %v3122_v51  ;;  %v3231_v50 = vld [vmem:[#allocation5 + $0x140] ss:$8 sps:$4 sm:$0xff]   ;;  %v3194_v51 = vld [vmem:[#allocation5 + $0x14] ss:$8 sps:$4 sm:$0xff]  }
  0xf9   :  { %1924 = vmatprep.subr.bf16.mxu1 %v3125_v53  ;;  %v3236_v53 = vld [vmem:[#allocation5 + $0x134] ss:$8 sps:$4 sm:$0xff]  }
  0xfb   :  { %1884 = vmatpush1.bf16.msra.mxu0 %v3120_v54  ;;  %v3192_v54 = vld [vmem:[#allocation5 + $0x10] ss:$8 sps:$4 sm:$0xff]  }
  0xfc   :  { %1925 = vmatpush1.bf16.msra.mxu1 %v3123_v55  ;;  %1885 = vmatprep.subr.bf16.mxu0 %v3128_v56  ;;  %v3234_v55 = vld [vmem:[#allocation5 + $0x130] ss:$8 sps:$4 sm:$0xff]   ;;  %v3197_v56 = vld [vmem:[#allocation5 + $0x4] ss:$8 sps:$4 sm:$0xff]  }
  0xfd   :  { %1926 = vmatprep.subr.bf16.mxu1 %v3131_v57  ;;  %v3239_v57 = vld [vmem:[#allocation5 + $0x124] ss:$8 sps:$4 sm:$0xff]  }
  0xff   :  { %1886 = vmatpush2.bf16.msra.mxu0 %v3126_v58  ;;  %v3195_v58 = vld [vmem:[#allocation5] ss:$8 sps:$4 sm:$0xff]  }
 0x100   :  { %1927 = vmatpush2.bf16.msra.mxu1 %v3129_v59  ;;  %1887 = vmatprep.subr.bf16.mxu0 %v3134_v60  ;;  %v3237_v59 = vld [vmem:[#allocation5 + $0x120] ss:$8 sps:$4 sm:$0xff]   ;;  %v3200_v60 = vld [vmem:[#allocation5 + $0xf4] ss:$8 sps:$4 sm:$0xff]  }
 0x101   :  { %1928 = vmatprep.subr.bf16.mxu1 %v3137_v61  ;;  %v3242_v61 = vld [vmem:[#allocation5 + $0x114] ss:$8 sps:$4 sm:$0xff]  }
 0x103   :  { %1888 = vmatpush2.bf16.msra.mxu0 %v3132_v62  ;;  %v3198_v62 = vld [vmem:[#allocation5 + $0xf0] ss:$8 sps:$4 sm:$0xff]  }
 0x104   :  { %1929 = vmatpush2.bf16.msra.mxu1 %v3135_v63  ;;  %1889 = vmatprep.subr.bf16.mxu0 %v3140_v0  ;;  %v3240_v63 = vld [vmem:[#allocation5 + $0x110] ss:$8 sps:$4 sm:$0xff]   ;;  %v3203_v0 = vld [vmem:[#allocation5 + $0xe4] ss:$8 sps:$4 sm:$0xff]  }
 0x105   :  { %1930 = vmatprep.subr.bf16.mxu1 %v3143_v1  ;;  %v3245_v1 = vld [vmem:[#allocation5 + $0x104] ss:$8 sps:$4 sm:$0xff]  }
 0x107   :  { %1890 = vmatpush2.bf16.msra.mxu0 %v3138_v2  ;;  %v3201_v2 = vld [vmem:[#allocation5 + $0xe0] ss:$8 sps:$4 sm:$0xff]  }
 0x108   :  { %1931 = vmatpush2.bf16.msra.mxu1 %v3141_v3  ;;  %1891 = vmatprep.subr.bf16.mxu0 %v3146_v4  ;;  %v3243_v3 = vld [vmem:[#allocation5 + $0x100] ss:$8 sps:$4 sm:$0xff]   ;;  %v3206_v4 = vld [vmem:[#allocation5 + $0xd4] ss:$8 sps:$4 sm:$0xff]  }
 0x109   :  { %1932 = vmatprep.subr.bf16.mxu1 %v3149_v5  ;;  %v3248_v5 = vld [vmem:[#allocation5 + $0x1f4] ss:$8 sps:$4 sm:$0xff]  }
 0x10b   :  { %1892 = vmatpush2.bf16.msra.mxu0 %v3144_v6  ;;  %v3204_v6 = vld [vmem:[#allocation5 + $0xd0] ss:$8 sps:$4 sm:$0xff]  }
 0x10c   :  { %1933 = vmatpush2.bf16.msra.mxu1 %v3147_v7  ;;  %1893 = vmatprep.subr.bf16.mxu0 %v3152_v10  ;;  %v3246_v7 = vld [vmem:[#allocation5 + $0x1f0] ss:$8 sps:$4 sm:$0xff]   ;;  %v3209_v10 = vld [vmem:[#allocation5 + $0xc4] ss:$8 sps:$4 sm:$0xff]  }
 0x10d   :  { %1934 = vmatprep.subr.bf16.mxu1 %v3155_v11  ;;  %v3251_v11 = vld [vmem:[#allocation5 + $0x1e4] ss:$8 sps:$4 sm:$0xff]  }
 0x10f   :  { %1894 = vmatpush2.bf16.msra.mxu0 %v3150_v12  ;;  %v3207_v12 = vld [vmem:[#allocation5 + $0xc0] ss:$8 sps:$4 sm:$0xff]  }
 0x110   :  { %1935 = vmatpush2.bf16.msra.mxu1 %v3153_v13  ;;  %1895 = vmatprep.subr.bf16.mxu0 %v3158_v14  ;;  %v3249_v13 = vld [vmem:[#allocation5 + $0x1e0] ss:$8 sps:$4 sm:$0xff]   ;;  %v3212_v14 = vld [vmem:[#allocation5 + $0xb4] ss:$8 sps:$4 sm:$0xff]  }
 0x111   :  { %1936 = vmatprep.subr.bf16.mxu1 %v3161_v15  ;;  %v3254_v15 = vld [vmem:[#allocation5 + $0x1d4] ss:$8 sps:$4 sm:$0xff]  }
 0x113   :  { %1896 = vmatpush2.bf16.msra.mxu0 %v3156_v16  ;;  %v323_v16 = vlaneseq }
 0x114   :  { %1937 = vmatpush2.bf16.msra.mxu1 %v3159_v17  ;;  %1897 = vmatprep.subr.bf16.mxu0 %v3164_v18  ;;  %v3210_v17 = vld [vmem:[#allocation5 + $0xb0] ss:$8 sps:$4 sm:$0xff]  }
 0x115   :  { %1938 = vmatprep.subr.bf16.mxu1 %v3167_v19  ;;  %v3252_v18 = vld [vmem:[#allocation5 + $0x1d0] ss:$8 sps:$4 sm:$0xff]   ;;  %v3215_v19 = vld [vmem:[#allocation5 + $0xa4] ss:$8 sps:$4 sm:$0xff]  }
 0x117   :  { %1898 = vmatpush2.bf16.msra.mxu0 %v3162_v22  ;;  %v3257_v22 = vld [vmem:[#allocation5 + $0x1c4] ss:$8 sps:$4 sm:$0xff]  }
 0x118   :  { %1939 = vmatpush2.bf16.msra.mxu1 %v3165_v23  ;;  %1899 = vmatprep.subr.bf16.mxu0 %v3170_v24  ;;  %v3443_v23 = vshrl.u32 %v323_v16, 7  ;;  %v3213_v24 = vld [vmem:[#allocation5 + $0xa0] ss:$8 sps:$4 sm:$0xff]  }
 0x119   :  { %1940 = vmatprep.subr.bf16.mxu1 %v3173_v25  ;;  %v3255_v25 = vld [vmem:[#allocation5 + $0x1c0] ss:$8 sps:$4 sm:$0xff]  }
 0x11b   :  { %1900 = vmatpush2.bf16.msra.mxu0 %v3168_v26  ;;  %v3218_v26 = vld [vmem:[#allocation5 + $0x94] ss:$8 sps:$4 sm:$0xff]  }
 0x11c   :  { %1941 = vmatpush2.bf16.msra.mxu1 %v3171_v27  ;;  %2363 = vmatprep.subr.bf16.mxu0 %v3176_v28  ;;  %v3260_v27 = vld [vmem:[#allocation5 + $0x1b4] ss:$8 sps:$4 sm:$0xff]   ;;  %v325_v28 = vsub.s32 0, %v3443_v23 }
 0x11e   :  { %v3433_v31 = vpop.f32.mrf.mxu0  ;;  %1902 = vmatmul.mubr.bf16.vlgmr.msra.gmra.mxu0 %v3421_v20  ;;  %v3224_v20 = vld [vmem:[#allocation5 + $0x174] ss:$8 sps:$4 sm:$0xff]  }
 0x11f   :  { %v3435_v32 = vpop.f32.mrf.mxu1  ;;  %1943 = vmatmul.mubr.bf16.vlgmr.msra.gmra.mxu1 %v3423_v21  ;;  %2364 = vmatpush1.bf16.msra.mxu0 %v3174_v29  ;;  %v3183_v21 = vld [vmem:[#allocation5 + $0x40] ss:$8 sps:$4 sm:$0xff]  }
 0x120   :  { %v3439_v34 = vpop.f32.mrf.mxu0  ;;  %2365 = vmatprep.subr.bf16.mxu0 %v3179_v30  ;;  %2404 = vmatprep.subr.bf16.mxu1 %v3224_v20  ;;  %v3449_v29 = vld [vmem:[%s3478_s2] sm:$0xf]  ;;  %v329_v30 = vsub.s32 1, %v3443_v23  ;;  %v3263_v20 = vld [vmem:[#allocation5 + $0x1a4] ss:$8 sps:$4 sm:$0xff]  }
 0x121   :  { %v3441_v35 = vpop.f32.mrf.mxu1  ;;  %2405 = vmatpush1.bf16.msra.mxu1 %v3222_v41 }
 0x122   :  { %v1661_v38 = vpop.f32.mrf.mxu0  ;;  %2406 = vmatprep.subr.bf16.mxu1 %v3227_v42 }
 0x123   :  { %v1702_v39 = vpop.f32.mrf.mxu1  ;;  %2366 = vmatpush1.bf16.msra.mxu0 %v3177_v33  ;;  %v3216_v33 = vld [vmem:[#allocation5 + $0x90] ss:$8 sps:$4 sm:$0xff]   ;;  %v3221_v38 = vld [vmem:[#allocation5 + $0x84] ss:$8 sps:$4 sm:$0xff]  }
 0x124   :  { %v1662_v8 = vpop.f32.mrf.mxu0  ;;  %2367 = vmatprep.subr.bf16.mxu0 %v3182_v36  ;;  %v3258_v36 = vld [vmem:[#allocation5 + $0x1b0] ss:$8 sps:$4 sm:$0xff]   ;;  %v326_v39 = vrot.slane %v3449_v29, %v325_v28 }
 0x125   :  { %v1703_v9 = vpop.f32.mrf.mxu1  ;;  %2407 = vmatpush1.bf16.msra.mxu1 %v3225_v37  ;;  %v3219_v8 = vld [vmem:[#allocation5 + $0x80] ss:$8 sps:$4 sm:$0xff]  }
 0x126   :  { %2408 = vmatprep.subr.bf16.mxu1 %v3230_v43  ;;  %v1658_v9 = vadd.f32 %v3433_v31, %v326_v39  ;;  %v3261_v37 = vld [vmem:[#allocation5 + $0x1a0] ss:$8 sps:$4 sm:$0xff]  }
 0x127   :  { %2368 = vmatpush1.bf16.msra.mxu0 %v3180_v49  ;;  %v330_v49 = vrot.slane %v3449_v29, %v329_v30 }
 0x128   :  { %2369 = vmatprep.subr.bf16.mxu0 %v3185_v52  ;;  %v1699_v41 = vadd.f32 %v3435_v32, %v1658_v9 }
 0x129   :  { %2409 = vmatpush1.bf16.msra.mxu1 %v3228_v45  ;;  %v1660_v52 = vadd.f32 %v3439_v34, %v330_v49  ;;  %v3264_v34 = vld [vmem:[#allocation5 + $0x190] ss:$8 sps:$4 sm:$0xff]  }
 0x12a   :  { %2410 = vmatprep.subr.bf16.mxu1 %v3233_v47 }
 0x12b   :  { %2370 = vmatpush1.bf16.msra.mxu0 %v3183_v21 }
 0x12c   :  { %2371 = vmatprep.subr.bf16.mxu0 %v3188_v40  ;;  %v1701_v40 = vadd.f32 %v3441_v35, %v1660_v52 }
 0x12d   :  { %2411 = vmatpush1.bf16.msra.mxu1 %v3231_v50 }
 0x12e   :  { %2412 = vmatprep.subr.bf16.mxu1 %v3236_v53 }
 0x12f   :  { %2372 = vmatpush1.bf16.msra.mxu0 %v3186_v44 }
 0x130   :  { %2373 = vmatprep.subr.bf16.mxu0 %v3191_v46 }
 0x131   :  { %2413 = vmatpush1.bf16.msra.mxu1 %v3234_v55  ;;  %v3269_v55 = vld [vmem:[#allocation5 + $0x184] ss:$8 sps:$4 sm:$0xff]  }
 0x132   :  { %2414 = vmatprep.subr.bf16.mxu1 %v3239_v57  ;;  %v3267_v57 = vld [vmem:[#allocation5 + $0x180] ss:$8 sps:$4 sm:$0xff]  }
 0x133   :  { %2374 = vmatpush1.bf16.msra.mxu0 %v3189_v48  ;;  %v3266_v48 = vld [vmem:[#allocation5 + $0x194] ss:$8 sps:$4 sm:$0xff]  }
 0x134   :  { %2375 = vmatprep.subr.bf16.mxu0 %v3194_v51 }
 0x135   :  { %2415 = vmatpush1.bf16.msra.mxu1 %v3237_v59 }
 0x136   :  { %2416 = vmatprep.subr.bf16.mxu1 %v3242_v61 }
 0x137   :  { %2376 = vmatpush1.bf16.msra.mxu0 %v3192_v54 }
 0x138   :  { %2377 = vmatprep.subr.bf16.mxu0 %v3197_v56 }
 0x139   :  { %2417 = vmatpush1.bf16.msra.mxu1 %v3240_v63 }
 0x13a   :  { %2418 = vmatprep.subr.bf16.mxu1 %v3245_v1 }
 0x13b   :  { %2378 = vmatpush1.bf16.msra.mxu0 %v3195_v58 }
 0x13c   :  { %2379 = vmatprep.subr.bf16.mxu0 %v3200_v60 }
 0x13d   :  { %2419 = vmatpush1.bf16.msra.mxu1 %v3243_v3 }
 0x13e   :  { %2420 = vmatprep.subr.bf16.mxu1 %v3248_v5  ;;  %v333_v5 = vsub.s32 2, %v3443_v23 }
 0x13f   :  { %2380 = vmatpush2.bf16.msra.mxu0 %v3198_v62 }
 0x140   :  { %2381 = vmatprep.subr.bf16.mxu0 %v3203_v0 }
 0x141   :  { %2421 = vmatpush2.bf16.msra.mxu1 %v3246_v7  ;;  %v334_v7 = vrot.slane %v3449_v29, %v333_v5 }
 0x142   :  { %2422 = vmatprep.subr.bf16.mxu1 %v3251_v11 }
 0x143   :  { %2382 = vmatpush2.bf16.msra.mxu0 %v3201_v2 }
 0x144   :  { %2383 = vmatprep.subr.bf16.mxu0 %v3206_v4 }
 0x145   :  { %2423 = vmatpush2.bf16.msra.mxu1 %v3249_v13 }
 0x146   :  { %2424 = vmatprep.subr.bf16.mxu1 %v3254_v15 }
 0x147   :  { %2384 = vmatpush2.bf16.msra.mxu0 %v3204_v6  ;;  %v337_v6 = vsub.s32 3, %v3443_v23 }
 0x148   :  { %2385 = vmatprep.subr.bf16.mxu0 %v3209_v10 }
 0x149   :  { %2425 = vmatpush2.bf16.msra.mxu1 %v3252_v18  ;;  %v338_v10 = vrot.slane %v3449_v29, %v337_v6 }
 0x14a   :  { %2426 = vmatprep.subr.bf16.mxu1 %v3257_v22 }
 0x14b   :  { %2386 = vmatpush2.bf16.msra.mxu0 %v3207_v12 }
 0x14c   :  { %2387 = vmatprep.subr.bf16.mxu0 %v3212_v14 }
 0x14d   :  { %2427 = vmatpush2.bf16.msra.mxu1 %v3255_v25 }
 0x14e   :  { %2428 = vmatprep.subr.bf16.mxu1 %v3260_v27 }
 0x14f   :  { %2388 = vmatpush2.bf16.msra.mxu0 %v3210_v17 }
 0x150   :  { %2389 = vmatprep.subr.bf16.mxu0 %v3215_v19 }
 0x151   :  { %2429 = vmatpush2.bf16.msra.mxu1 %v3258_v36 }
 0x152   :  { %2430 = vmatprep.subr.bf16.mxu1 %v3263_v20 }
 0x153   :  { %2390 = vmatpush2.bf16.msra.mxu0 %v3213_v24 }
 0x154   :  { %2391 = vmatprep.subr.bf16.mxu0 %v3218_v26 }
 0x155   :  { %2431 = vmatpush2.bf16.msra.mxu1 %v3261_v37 }
 0x156   :  { %2432 = vmatprep.subr.bf16.mxu1 %v3266_v48 }
 0x157   :  { %2392 = vmatpush2.bf16.msra.mxu0 %v3216_v33 }
 0x158   :  { %2393 = vmatprep.subr.bf16.mxu0 %v3221_v38 }
 0x159   :  { %2433 = vmatpush2.bf16.msra.mxu1 %v3264_v34 }
 0x15a   :  { %2434 = vmatprep.subr.bf16.mxu1 %v3269_v55 }
 0x15b   :  { %2394 = vmatpush2.bf16.msra.mxu0 %v3219_v8 }
 0x15d   :  { %2435 = vmatpush2.bf16.msra.mxu1 %v3267_v57 }
 0x15e   :  { %v1739_v42 = vpop.f32.mrf.mxu0 }
 0x15f   :  { %v1780_v21 = vpop.f32.mrf.mxu1  ;;  %v1740_v43 = vadd.f32 %v1739_v42, %v1699_v41 }
 0x160   :  { %v1741_v44 = vpop.f32.mrf.mxu0 }
 0x161   :  { %v1782_v45 = vpop.f32.mrf.mxu1  ;;  %v1781_v46 = vadd.f32 %v1780_v21, %v1740_v43  ;;  %v1742_v47 = vadd.f32 %v1741_v44, %v1701_v40  ;;  %v2031_v21 = vld [vmem:[%s3480_s4] sm:$0x3]  ;;  %s3310_s4 = scalar_lea.vmem %s2454_s24, 256 }
 0x162   :  { %v1743_v31 = vpop.f32.mrf.mxu0  ;;  %v2036_v37 = vrot.slane %v2031_v21, %v325_v28  ;;  %v2040_v40 = vrot.slane %v2031_v21, %v329_v30  ;;  %p3311_p10 = scmp.ne.s32.totalorder %s2454_s24, %s3310_s4  ;;  %p3316_p12 = scmp.lt.s32.totalorder %s3310_s4, %s3310_s4 }
 0x163   :  { %v1784_v50 = vpop.f32.mrf.mxu1  ;;  %vm1951_vm0 = vcmp.gt.f32.partialorder %v1781_v46, 0.0  ;;  %v1955_v51 = vmul.f32 0.01, %v1781_v46  ;;  %v1783_v32 = vadd.f32 %v1782_v45, %v1742_v47 }
 0x164   :  { %v1744_v53 = vpop.f32.mrf.mxu0  ;;  %p3317_p13 = por %p3316_p12, %p3315_p11 }
 0x165   :  { %v1785_v54 = vpop.f32.mrf.mxu1  ;;  %vm1952_vm1 = vcmp.gt.f32.partialorder %v1783_v32, 0.0  ;;  %v1956_v35 = vmul.f32 0.01, %v1783_v32  ;;  %v1959_v56 = vsel %vm1951_vm0, %v1781_v46, %v1955_v51 }
 0x166   :  { %v1963_v60 = vpack.c.bf16 %v1959_v56, %v1959_v56  ;;  %p3318_p0 = pnand %p3317_p13, %p3311_p10 }
 0x167   :  { %v1960_v58 = vsel %vm1952_vm1, %v1783_v32, %v1956_v35 }
 0x168   :  { %v1964_v59 = vpack.c.bf16 %v1960_v58, %v1960_v58 }
 0x16a   :  { %2395 = vmatprep.mubr.bf16.mxu0 %v1964_v59 }
 0x16b   :  { %2396 = vmatmul.mubr.bf16.vlgmr.msra.gmra.mxu0 %v1963_v60 }
 0x19e   :  { %v1821_v61 = vpop.f32.mrf.mxu0 }
 0x19f   :  { %v1862_v62 = vpop.f32.mrf.mxu1  ;;  %v1822_v11 = vadd.f32 %v1821_v61, %v334_v7 }
 0x1a0   :  { %v1823_v63 = vpop.f32.mrf.mxu0 }
 0x1a1   :  { %v1864_v0 = vpop.f32.mrf.mxu1  ;;  %v1824_v12 = vadd.f32 %v1823_v63, %v338_v10  ;;  %v1863_v13 = vadd.f32 %v1862_v62, %v1822_v11 }
 0x1a2   :  { %v1825_v1 = vpop.f32.mrf.mxu0 }
 0x1a3   :  { %v1866_v2 = vpop.f32.mrf.mxu1  ;;  %v1865_v16 = vadd.f32 %v1864_v0, %v1824_v12 }
 0x1a4   :  { %v1826_v3 = vpop.f32.mrf.mxu0 }
 0x1a5   :  { %v1867_v4 = vpop.f32.mrf.mxu1 }
 0x1de   :  { %v1903_v14 = vpop.f32.mrf.mxu0 }
 0x1df   :  { %v1944_v15 = vpop.f32.mrf.mxu1  ;;  %v1904_v17 = vadd.f32 %v1903_v14, %v1863_v13 }
 0x1e0   :  { %v1905_v18 = vpop.f32.mrf.mxu0 }
 0x1e1   :  { %v1946_v19 = vpop.f32.mrf.mxu1  ;;  %v1945_v22 = vadd.f32 %v1944_v15, %v1904_v17  ;;  %v1906_v24 = vadd.f32 %v1905_v18, %v1865_v16 }
 0x1e2   :  { %v1907_v25 = vpop.f32.mrf.mxu0 }
 0x1e3   :  { %v1948_v26 = vpop.f32.mrf.mxu1  ;;  %vm1953_vm2 = vcmp.gt.f32.partialorder %v1945_v22, 0.0  ;;  %v1957_v27 = vmul.f32 0.01, %v1945_v22  ;;  %v1947_v33 = vadd.f32 %v1946_v19, %v1906_v24 }
 0x1e4   :  { %v1908_v36 = vpop.f32.mrf.mxu0 }
 0x1e5   :  { %v1949_v38 = vpop.f32.mrf.mxu1  ;;  %vm1954_vm3 = vcmp.gt.f32.partialorder %v1947_v33, 0.0  ;;  %v1958_v29 = vmul.f32 0.01, %v1947_v33  ;;  %v1961_v39 = vsel %vm1953_vm2, %v1945_v22, %v1957_v27 }
 0x1e6   :  { %v1965_v9 = vpack.c.bf16 %v1961_v39, %v1961_v39 }
 0x1e7   :  { %v1962_v49 = vsel %vm1954_vm3, %v1947_v33, %v1958_v29 }
 0x1e8   :  { %v1966_v8 = vpack.c.bf16 %v1962_v49, %v1962_v49 }
 0x1ea   :  { %2436 = vmatprep.mubr.bf16.mxu1 %v1966_v8 }
 0x1eb   :  { %2437 = vmatmul.mubr.bf16.vlgmr.msra.gmra.mxu1 %v1965_v9 }
 0x22b   :  { %v2397_v52 = vpop.f32.mrf.mxu0 }
 0x22c   :  { %v2398_v43 = vadd.f32 %v2397_v52, %v2036_v37 }
 0x22d   :  { %v2399_v41 = vpop.f32.mrf.mxu0 }
 0x22e   :  { %v2400_v45 = vadd.f32 %v2399_v41, %v2040_v40 }
 0x22f   :  { %v2401_v20 = vpop.f32.mrf.mxu0 }
 0x231   :  { %v2402_v42 = vpop.f32.mrf.mxu0 }
 0x2ab   :  { %v2438_v44 = vpop.f32.mrf.mxu1 }
 0x2ac   :  { %v2439_v46 = vadd.f32 %v2438_v44, %v2398_v43 }
 0x2ad   :  { %v2440_v47 = vpop.f32.mrf.mxu1 }
 0x2ae   :  { %2445 = vst [vmem:[#allocation7] sm:$0xff] %v2439_v46  ;;  %v2441_v48 = vadd.f32 %v2440_v47, %v2400_v45 }
 0x2af   :  { %v2442_v31 = vpop.f32.mrf.mxu1 }
 0x2b0   :  { %2446 = vst [vmem:[#allocation7 + $0x8] sm:$0xff] %v2441_v48 }
 0x2b1   :  { %v2443_v50 = vpop.f32.mrf.mxu1 }
 0x2b2   :  { %3321 = shalt.err (!%p3318_p0)
}
 0x2b3   :  { %2456 = dma.vmem_to_hbm [thread:$0]  %s2454_s24, 256, %s3481_s5, [#allocation4]  }
 0x2b4   :  { %3334 = dma.done.wait [#allocation4], 256  }
 0x2b5   :  { %3335 = vsyncadd [#allocation4], 4294967040 }
 0x2b6   :  { %2460 = vsyncpa [#allocation3], 1 }
 0x2b7   :  { %2461 = vsyncpa [#allocation6], 1 }
 0x2b8   :  { %2462 = vsyncpa [#allocation4], 1 }

</bundles_post_ra>
